<compile_context>
chip_gen: v7x
topology: tpu7x:2x2x1
jax: 0.10.0
libtpu: 0.0.40
codegen_flags: <defaults>
</compile_context>

<pallas_src>
import jax
import jax.numpy as jnp
from jax.experimental import pallas as pl
from jax.experimental.pallas import tpu as pltpu


def _mlp_edge_kernel(idx_ref, ht_ref, w1t_ref, b1_ref, w2_ref, b2_ref, out_ref):
    # idx_ref: (1, 2*TE) int32 packed endpoints: lanes [0,TE) = src, [TE,2TE) = dst
    # ht_ref:  (F, N) node features, transposed, VMEM-resident
    # w1t_ref: (H, F) first linear weight, transposed
    # b1_ref:  (H, 1) first bias (broadcast along lanes)
    # w2_ref:  (H, 1) second linear weight as a column
    # b2_ref:  (1, 1) second bias
    # out_ref: (1, TE) per-edge scores (lane-dense)
    n_nodes = ht_ref.shape[1]
    te = out_ref.shape[1]

    idx = idx_ref[...]                                            # (1, 2*TE) int32

    # In-kernel gather: one-hot (N, 2*TE) built on the VPU, applied on the MXU.
    node_ids = jax.lax.broadcasted_iota(jnp.int32, (n_nodes, 2 * te), 0)
    onehot = (node_ids == idx).astype(jnp.float32)                # (N, 2*TE)

    # Single MXU matmul gathers both endpoints' features at once.
    gathered = jnp.dot(ht_ref[...], onehot,
                       preferred_element_type=jnp.float32)        # (F, 2*TE)
    hs_t = gathered[:, :te]                                       # (F, TE) = h[src].T
    hd_t = gathered[:, te:]                                       # (F, TE) = h[dst].T
    he_t = hs_t * hd_t                                            # (F, TE)

    # First linear + ReLU, edge axis stays on lanes.
    z = jnp.dot(w1t_ref[...], he_t,
                preferred_element_type=jnp.float32) + b1_ref[...]   # (H, TE)
    a = jnp.maximum(z, 0.0)

    # Second linear (hidden -> 1) as VPU multiply + sublane reduce; the result
    # is already a lane-dense (1, TE) row — no narrow (TE, 1) intermediate.
    s = jnp.sum(a * w2_ref[...], axis=0, keepdims=True) + b2_ref[...]   # (1, TE)
    out_ref[...] = s


def mlp_predictor_edge_scores(h, src, dst, w1, b1, w2, b2, *, tile_e=8192):
    """Per-edge scores  W2(relu(W1(h[src] * h[dst]))).squeeze(-1)  -> (E,) f32.

    h: (N, F) node features; src/dst: (E,) int32 edge endpoints;
    w1: (F, H), b1: (H,), w2: (H, 1), b2: (1,).
    Assumes N x F and the (N, 2*tile_e) one-hot fit in VMEM — the regime this
    module targets (h_feats=16, hidden=32, modest node count).
    """
    E = int(src.shape[0])
    N, F_ = h.shape
    H = w1.shape[1]

    # Edge tile: multiple of 128 (lane-dense blocks), clamped so we never tile
    # wider than the (padded) edge count. Sweep 4096-16384 for very large E;
    # keep E // tile_e >= 2 on v7x so both TensorCores get work.
    tile_e = max(128, (int(tile_e) // 128) * 128)
    tile_e = min(tile_e, pl.cdiv(E, 128) * 128)
    num_tiles = pl.cdiv(E, tile_e)
    e_pad = num_tiles * tile_e
    pad = e_pad - E

    # Only the int32 index stream is padded (gathered features never touch HBM).
    # Pack [src | dst] along lanes so each grid step needs a single index DMA.
    src_p = jnp.pad(src.astype(jnp.int32), (0, pad)).reshape(num_tiles, 1, tile_e)
    dst_p = jnp.pad(dst.astype(jnp.int32), (0, pad)).reshape(num_tiles, 1, tile_e)
    idx_p = jnp.concatenate([src_p, dst_p], axis=-1)   # (num_tiles, 1, 2*tile_e)

    # Tiny, fully VMEM-resident parameters laid out "edge axis on lanes".
    h_t = h.astype(jnp.float32).T                     # (F, N)
    w1_t = w1.astype(jnp.float32).T                   # (H, F)
    b1_c = b1.astype(jnp.float32).reshape(H, 1)       # (H, 1)
    w2_c = w2.astype(jnp.float32).reshape(H, 1)       # (H, 1)
    b2_c = b2.astype(jnp.float32).reshape(1, 1)       # (1, 1)

    idx_spec = pl.BlockSpec((None, 1, 2 * tile_e), lambda i: (i, 0, 0))

    def resident(shape):
        return pl.BlockSpec(shape, lambda i: (0, 0))

    out = pl.pallas_call(
        _mlp_edge_kernel,
        out_shape=jax.ShapeDtypeStruct((num_tiles, 1, tile_e), jnp.float32),
        grid=(num_tiles,),
        in_specs=[
            idx_spec,                 # packed [src | dst] indices (1, 2*tile_e)
            resident((F_, N)),        # h^T          (resident)
            resident((H, F_)),        # W1^T         (resident)
            resident((H, 1)),         # b1           (resident)
            resident((H, 1)),         # w2 column    (resident)
            resident((1, 1)),         # b2           (resident)
        ],
        out_specs=pl.BlockSpec((None, 1, tile_e), lambda i: (i, 0, 0)),
        compiler_params=pltpu.CompilerParams(
            dimension_semantics=("parallel",)),
    )(idx_p, h_t, w1_t, b1_c, w2_c, b2_c)

    return out.reshape(e_pad)[:E]


def _reference(h, src, dst, w1, b1, w2, b2):
    he = h[src] * h[dst]
    z = jnp.maximum(he @ w1 + b1, 0.0)
    return (z @ w2 + b2).squeeze(-1)


if __name__ == "__main__":
    key = jax.random.PRNGKey(0)
    k_h, k_src, k_dst, k_w1, k_b1, k_w2, k_b2 = jax.random.split(key, 7)

    # shapes consistent with the module: h_feats=16, hidden=32
    N = 8          # nodes
    F_ = 16        # h_feats
    E = 4100       # edges (non-multiple of 128 -> exercises the padded tail)

    h = jax.random.normal(k_h, (N, F_), dtype=jnp.float32)
    src = jax.random.randint(k_src, (E,), 0, N, dtype=jnp.int32)
    dst = jax.random.randint(k_dst, (E,), 0, N, dtype=jnp.int32)

    # synthetic parameters (nn.Linear(h_feats, 32), nn.Linear(32, 1))
    w1 = jax.random.normal(k_w1, (F_, 32), dtype=jnp.float32) * 0.1
    b1 = jax.random.normal(k_b1, (32,), dtype=jnp.float32) * 0.1
    w2 = jax.random.normal(k_w2, (32, 1), dtype=jnp.float32) * 0.1
    b2 = jax.random.normal(k_b2, (1,), dtype=jnp.float32) * 0.1

    scores = mlp_predictor_edge_scores(h, src, dst, w1, b1, w2, b2)
    scores = jax.block_until_ready(scores)

    ref = _reference(h, src, dst, w1, b1, w2, b2)
    assert scores.shape == (E,)
    assert jnp.allclose(scores, ref, atol=1e-5, rtol=1e-5)
    print("KERNEL_OK")
</pallas_src>

<mosaic_0001>
module attributes {stable_mosaic.version = 11 : i64} {
  func.func @_mlp_edge_kernel(%arg0: i32, %arg1: memref<1x1x8448xi32, #tpu.memory_space<vmem>>, %arg2: memref<16x8xf32, #tpu.memory_space<vmem>>, %arg3: memref<32x16xf32, #tpu.memory_space<vmem>>, %arg4: memref<32x1xf32, #tpu.memory_space<vmem>>, %arg5: memref<32x1xf32, #tpu.memory_space<vmem>>, %arg6: memref<1x1xf32, #tpu.memory_space<vmem>>, %arg7: memref<1x1x4224xf32, #tpu.memory_space<vmem>>) attributes {dimension_semantics = [#tpu.dimension_semantics<parallel>], iteration_bounds = array<i64: 1>, scalar_prefetch = 0 : i64, scratch_operands = 0 : i64, tpu.core_type = #tpu.core_type<tc>, window_params = [{transform_indices = @transform_0, window_bounds = array<i64: 1, 1, 8448>}, {pipeline_mode = #tpu.pipeline_mode<synchronous>, transform_indices = @transform_1, window_bounds = array<i64: 16, 8>}, {pipeline_mode = #tpu.pipeline_mode<synchronous>, transform_indices = @transform_2, window_bounds = array<i64: 32, 16>}, {pipeline_mode = #tpu.pipeline_mode<synchronous>, transform_indices = @transform_3, window_bounds = array<i64: 32, 1>}, {pipeline_mode = #tpu.pipeline_mode<synchronous>, transform_indices = @transform_4, window_bounds = array<i64: 32, 1>}, {pipeline_mode = #tpu.pipeline_mode<synchronous>, transform_indices = @transform_5, window_bounds = array<i64: 1, 1>}, {transform_indices = @transform_6, window_bounds = array<i64: 1, 1, 4224>}]} {
    %c0 = arith.constant 0 : index
    %c0_0 = arith.constant 0 : index
    %c0_1 = arith.constant 0 : index
    %0 = vector.load %arg1[%c0, %c0_0, %c0_1] : memref<1x1x8448xi32, #tpu.memory_space<vmem>>, vector<1x1x8448xi32>
    %1 = vector.shape_cast %0 : vector<1x1x8448xi32> to vector<1x8448xi32>
    %2 = tpu.iota {dimensions = array<i32: 0>} : vector<8x8448xi32>
    %3 = vector.broadcast %1 : vector<1x8448xi32> to vector<8x8448xi32>
    %4 = arith.cmpi eq, %2, %3 : vector<8x8448xi32>
    %5 = arith.extui %4 : vector<8x8448xi1> to vector<8x8448xi32>
    %6 = arith.sitofp %5 : vector<8x8448xi32> to vector<8x8448xf32>
    %c0_2 = arith.constant 0 : index
    %c0_3 = arith.constant 0 : index
    %7 = vector.load %arg2[%c0_2, %c0_3] : memref<16x8xf32, #tpu.memory_space<vmem>>, vector<16x8xf32>
    %cst = arith.constant dense<0.000000e+00> : vector<16x8448xf32>
    %8 = tpu.matmul %7, %6, %cst {dimension_numbers = #tpu.dot_dimension_numbers<[1], [0], [0], [1], [0, 0, 1, 1], [], []>} : vector<16x8xf32>, vector<8x8448xf32>, vector<16x8448xf32> -> vector<16x8448xf32>
    %9 = vector.extract_strided_slice %8 {offsets = [0, 0], sizes = [16, 4224], strides = [1, 1]} : vector<16x8448xf32> to vector<16x4224xf32>
    %10 = vector.extract_strided_slice %8 {offsets = [0, 4224], sizes = [16, 4224], strides = [1, 1]} : vector<16x8448xf32> to vector<16x4224xf32>
    %11 = arith.mulf %9, %10 : vector<16x4224xf32>
    %c0_4 = arith.constant 0 : index
    %c0_5 = arith.constant 0 : index
    %12 = vector.load %arg3[%c0_4, %c0_5] : memref<32x16xf32, #tpu.memory_space<vmem>>, vector<32x16xf32>
    %cst_6 = arith.constant dense<0.000000e+00> : vector<32x4224xf32>
    %13 = tpu.matmul %12, %11, %cst_6 {dimension_numbers = #tpu.dot_dimension_numbers<[1], [0], [0], [1], [0, 0, 1, 1], [], []>} : vector<32x16xf32>, vector<16x4224xf32>, vector<32x4224xf32> -> vector<32x4224xf32>
    %c0_7 = arith.constant 0 : index
    %c0_8 = arith.constant 0 : index
    %14 = vector.load %arg4[%c0_7, %c0_8] : memref<32x1xf32, #tpu.memory_space<vmem>>, vector<32x1xf32>
    %15 = vector.broadcast %14 : vector<32x1xf32> to vector<32x4224xf32>
    %16 = arith.addf %13, %15 : vector<32x4224xf32>
    %cst_9 = arith.constant 0.000000e+00 : f32
    %17 = vector.broadcast %cst_9 : f32 to vector<32x4224xf32>
    %18 = arith.maximumf %16, %17 : vector<32x4224xf32>
    %c0_10 = arith.constant 0 : index
    %c0_11 = arith.constant 0 : index
    %19 = vector.load %arg5[%c0_10, %c0_11] : memref<32x1xf32, #tpu.memory_space<vmem>>, vector<32x1xf32>
    %20 = vector.broadcast %19 : vector<32x1xf32> to vector<32x4224xf32>
    %21 = arith.mulf %18, %20 : vector<32x4224xf32>
    %cst_12 = arith.constant dense<0.000000e+00> : vector<4224xf32>
    %22 = vector.multi_reduction <add>, %21, %cst_12 [0] : vector<32x4224xf32> to vector<4224xf32>
    %23 = vector.shape_cast %22 : vector<4224xf32> to vector<1x4224xf32>
    %c0_13 = arith.constant 0 : index
    %c0_14 = arith.constant 0 : index
    %24 = vector.load %arg6[%c0_13, %c0_14] : memref<1x1xf32, #tpu.memory_space<vmem>>, vector<1x1xf32>
    %25 = vector.broadcast %24 : vector<1x1xf32> to vector<1x4224xf32>
    %26 = arith.addf %23, %25 : vector<1x4224xf32>
    %c0_15 = arith.constant 0 : index
    %c0_16 = arith.constant 0 : index
    %c0_17 = arith.constant 0 : index
    %27 = vector.load %arg7[%c0_15, %c0_16, %c0_17] : memref<1x1x4224xf32, #tpu.memory_space<vmem>>, vector<1x1x4224xf32>
    %28 = vector.shape_cast %27 : vector<1x1x4224xf32> to vector<1x4224xf32>
    %29 = vector.shape_cast %26 : vector<1x4224xf32> to vector<1x1x4224xf32>
    tpu.vector_store %arg7[%c0_15, %c0_16, %c0_17], %29 {strides = array<i32>} : memref<1x1x4224xf32, #tpu.memory_space<vmem>>, vector<1x1x4224xf32>,
    return
  }
  func.func @transform_0(%arg0: i32) -> (i32, i32, i32) {
    %c0_i32 = arith.constant 0 : i32
    %c0_i32_0 = arith.constant 0 : i32
    %c0_i32_1 = arith.constant 0 : i32
    return %arg0, %c0_i32, %c0_i32_0 : i32, i32, i32
  }
  func.func @transform_1(%arg0: i32) -> (i32, i32) {
    %c0_i32 = arith.constant 0 : i32
    %c0_i32_0 = arith.constant 0 : i32
    %c0_i32_1 = arith.constant 0 : i32
    return %c0_i32, %c0_i32_0 : i32, i32
  }
  func.func @transform_2(%arg0: i32) -> (i32, i32) {
    %c0_i32 = arith.constant 0 : i32
    %c0_i32_0 = arith.constant 0 : i32
    %c0_i32_1 = arith.constant 0 : i32
    return %c0_i32, %c0_i32_0 : i32, i32
  }
  func.func @transform_3(%arg0: i32) -> (i32, i32) {
    %c0_i32 = arith.constant 0 : i32
    %c0_i32_0 = arith.constant 0 : i32
    %c0_i32_1 = arith.constant 0 : i32
    return %c0_i32, %c0_i32_0 : i32, i32
  }
  func.func @transform_4(%arg0: i32) -> (i32, i32) {
    %c0_i32 = arith.constant 0 : i32
    %c0_i32_0 = arith.constant 0 : i32
    %c0_i32_1 = arith.constant 0 : i32
    return %c0_i32, %c0_i32_0 : i32, i32
  }
  func.func @transform_5(%arg0: i32) -> (i32, i32) {
    %c0_i32 = arith.constant 0 : i32
    %c0_i32_0 = arith.constant 0 : i32
    %c0_i32_1 = arith.constant 0 : i32
    return %c0_i32, %c0_i32_0 : i32, i32
  }
  func.func @transform_6(%arg0: i32) -> (i32, i32, i32) {
    %c0_i32 = arith.constant 0 : i32
    %c0_i32_0 = arith.constant 0 : i32
    %c0_i32_1 = arith.constant 0 : i32
    return %arg0, %c0_i32, %c0_i32_0 : i32, i32, i32
  }
}

</mosaic_0001>

<bundles_post_ra>
// kernel: tpu_custom_call.1
= control target key start
LH: loop header
LB: loop body
LE: loop exit
PB: predicated region body
PF: predicated region fallthrough
CT: control target
= control target key end

     0   :  { %s7799_s0 = inlined_call_operand.vmem [shape: s32[1,1,8448], index: 0, kind: input, shape index: {}]   ;;  %s7800_s1 = inlined_call_operand.vmem [shape: f32[16,8], index: 1, kind: input, shape index: {}]   ;;  %s7801_s2 = inlined_call_operand.vmem [shape: f32[32,16], index: 2, kind: input, shape index: {}]   ;;  %s7802_s3 = inlined_call_operand.vmem [shape: f32[32,1], index: 3, kind: input, shape index: {}]   ;;  %s7803_s4 = inlined_call_operand.vmem [shape: f32[32,1], index: 4, kind: input, shape index: {}]   ;;  %s7804_s5 = inlined_call_operand.<no memory space> [shape: f32[1,1], index: 5, kind: input, shape index: {}]   ;;  %s7805_s6 = inlined_call_operand.hbm [shape: f32[1,1,4224], index: 6, kind: output, shape index: {}]  }
   0x1   :  { %v11_v0 = vstv %s7804_s5 }
   0x2   :  { %12 = vst [vmem:[#allocation2] sm:$0x1] %v11_v0 }
   0x3   :  { %v7806_v1 = vlaneseq  ;;  %v7807_v2 = vmov 0.0   ;;  %v26_v4 = vld [vmem:[%s7799_s0] sm:$0xff]  ;;  %vm501_vm0 = vcmask 64512  }
   0x4   :  { %572 = vmatprep.mubr.f32.mxu0 %v7807_v2  ;;  %649 = vmatprep.mubr.f32.mxu1 %v7807_v2 }
   0x5   :  { %v5991_v3 = vshrl.u32 %v7806_v1, 7 }
   0x7   :  { %7817 = vst [vmem:[#allocation6_spill] sm:$0xff] %v5991_v3 }
   0x8   :  { %13 = vsyncpa [#allocation4], 0  ;;  %v5997_v5 = vsub.s32 1, %v5991_v3  ;;  %v6000_v6 = vsub.s32 3, %v5991_v3  ;;  %v6003_v7 = vsub.s32 0, %v5991_v3  ;;  %v6006_v8 = vsub.s32 2, %v5991_v3 }
   0x9   :  { %v6009_v9 = vsub.s32 5, %v5991_v3  ;;  %v6012_v10 = vsub.s32 4, %v5991_v3  ;;  %v6015_v11 = vsub.s32 7, %v5991_v3  ;;  %v6018_v12 = vsub.s32 6, %v5991_v3  ;;  %v27_v21 = vld [vmem:[%s7799_s0 + $0x8] sm:$0xff]  ;;  %v6038_v22 = vld [vmem:[%s7800_s1] sm:$0xff] }
   0xa   :  { %7818 = vst [vmem:[#allocation7_spill] sm:$0xff] %v6003_v7  ;;  %v44_v13 = vrot.slane %v26_v4, %v5997_v5  ;;  %v52_v14 = vrot.slane %v26_v4, %v6000_v6  ;;  %v40_v15 = vrot.slane %v26_v4, %v6003_v7  ;;  %v48_v16 = vrot.slane %v26_v4, %v6006_v8  ;;  %v6059_v26 = vld [vmem:[%s7800_s1 + $0x8] sm:$0xff]  ;;  %v28_v31 = vld [vmem:[%s7799_s0 + $0x10] sm:$0xff]  ;;  %v29_v40 = vld [vmem:[%s7799_s0 + $0x18] sm:$0xff] }
   0xb   :  { %v60_v17 = vrot.slane %v26_v4, %v6009_v9  ;;  %v56_v18 = vrot.slane %v26_v4, %v6012_v10  ;;  %v68_v19 = vrot.slane %v26_v4, %v6015_v11  ;;  %v64_v20 = vrot.slane %v26_v4, %v6018_v12  ;;  %v30_v49 = vld [vmem:[%s7799_s0 + $0x20] sm:$0xff]  ;;  %v31_v58 = vld [vmem:[%s7799_s0 + $0x28] sm:$0xff] }
   0xc   :  { %vm302_vm1 = vcmp.eq.s32.totalorder %v5991_v3, %v44_v13  ;;  %vm304_vm2 = vcmp.eq.s32.totalorder %v5991_v3, %v52_v14  ;;  %vm301_vm3 = vcmp.eq.s32.totalorder %v5991_v3, %v40_v15  ;;  %vm303_vm4 = vcmp.eq.s32.totalorder %v5991_v3, %v48_v16  ;;  %v32_v14 = vld [vmem:[%s7799_s0 + $0x30] sm:$0xff] }
   0xd   :  { %v5946_v23 = vmov 1.0   ;;  %vm306_vm5 = vcmp.eq.s32.totalorder %v5991_v3, %v60_v17  ;;  %vm308_vm6 = vcmp.eq.s32.totalorder %v5991_v3, %v68_v19  ;;  %v76_v24 = vrot.slane %v27_v21, %v5997_v5 }
   0xe   :  { %5630 = vmatprep.subr.msk.mxu0 %vm302_vm1, %v5946_v23  ;;  %5634 = vmatprep.subr.msk.mxu1 %vm304_vm2, %v5946_v23  ;;  %vm305_vm7 = vcmp.eq.s32.totalorder %v5991_v3, %v56_v18  ;;  %vm307_vm8 = vcmp.eq.s32.totalorder %v5991_v3, %v64_v20  ;;  %v84_v25 = vrot.slane %v27_v21, %v6000_v6 }
   0xf   :  { %5631 = vmatpush1.msk.msra.mxu0 %vm301_vm3, %v5946_v23  ;;  %5635 = vmatpush1.msk.msra.mxu1 %vm303_vm4, %v5946_v23  ;;  %v72_v27 = vrot.slane %v27_v21, %v6003_v7  ;;  %vm310_vm9 = vcmp.eq.s32.totalorder %v5991_v3, %v76_v24  ;;  %v80_v28 = vrot.slane %v27_v21, %v6006_v8 }
  0x10   :  { %5632 = vmatmul.mubr.msk.f32.vlgmr.msra.gmra.mrb[0].mxu0 %vm501_vm0, %v6038_v22  ;;  %5636 = vmatmul.mubr.msk.f32.vlgmr.msra.gmra.mrb[0].mxu1 %vm501_vm0, %v6038_v22  ;;  %vm312_vm10 = vcmp.eq.s32.totalorder %v5991_v3, %v84_v25  ;;  %v92_v29 = vrot.slane %v27_v21, %v6009_v9  ;;  %v100_v30 = vrot.slane %v27_v21, %v6015_v11  ;;  %v33_v25 = vld [vmem:[%s7799_s0 + $0x38] sm:$0xff] }
  0x11   :  { %578 = vmatprep.mubr.f32.mxu0 %v7807_v2  ;;  %655 = vmatprep.mubr.f32.mxu1 %v7807_v2  ;;  %vm309_vm11 = vcmp.eq.s32.totalorder %v5991_v3, %v72_v27  ;;  %vm311_vm12 = vcmp.eq.s32.totalorder %v5991_v3, %v80_v28  ;;  %v88_v32 = vrot.slane %v27_v21, %v6012_v10 }
  0x12   :  { %5638 = vmatprep.subr.msk.mxu0 %vm306_vm5, %v5946_v23  ;;  %5642 = vmatprep.subr.msk.mxu1 %vm308_vm6, %v5946_v23  ;;  %vm314_vm13 = vcmp.eq.s32.totalorder %v5991_v3, %v92_v29  ;;  %vm316_vm14 = vcmp.eq.s32.totalorder %v5991_v3, %v100_v30  ;;  %v96_v33 = vrot.slane %v27_v21, %v6018_v12 }
  0x13   :  { %5639 = vmatpush1.msk.msra.mxu0 %vm305_vm7, %v5946_v23  ;;  %5643 = vmatpush1.msk.msra.mxu1 %vm307_vm8, %v5946_v23  ;;  %v108_v34 = vrot.slane %v28_v31, %v5997_v5  ;;  %v116_v35 = vrot.slane %v28_v31, %v6000_v6  ;;  %vm313_vm15 = vcmp.eq.s32.totalorder %v5991_v3, %v88_v32 }
  0x14   :  { %5633 = vmatmul.mubr.msk.f32.gmra.mrb[2].mxu0 %vm501_vm0, %v6059_v26  ;;  %5637 = vmatmul.mubr.msk.f32.gmra.mrb[2].mxu1 %vm501_vm0, %v6059_v26  ;;  %vm315_vm1 = vcmp.eq.s32.totalorder %v5991_v3, %v96_v33  ;;  %v104_v36 = vrot.slane %v28_v31, %v6003_v7  ;;  %v112_v37 = vrot.slane %v28_v31, %v6006_v8 }
  0x15   :  { %726 = vmatprep.mubr.f32.mxu0 %v7807_v2  ;;  %803 = vmatprep.mubr.f32.mxu1 %v7807_v2  ;;  %vm318_vm2 = vcmp.eq.s32.totalorder %v5991_v3, %v108_v34  ;;  %vm320_vm3 = vcmp.eq.s32.totalorder %v5991_v3, %v116_v35  ;;  %v124_v38 = vrot.slane %v28_v31, %v6009_v9 }
  0x16   :  { %5646 = vmatprep.subr.msk.mxu0 %vm310_vm9, %v5946_v23  ;;  %5650 = vmatprep.subr.msk.mxu1 %vm312_vm10, %v5946_v23  ;;  %v132_v39 = vrot.slane %v28_v31, %v6015_v11  ;;  %vm317_vm4 = vcmp.eq.s32.totalorder %v5991_v3, %v104_v36  ;;  %vm319_vm5 = vcmp.eq.s32.totalorder %v5991_v3, %v112_v37 }
  0x17   :  { %vm322_vm6 = vcmp.eq.s32.totalorder %v5991_v3, %v124_v38  ;;  %v120_v41 = vrot.slane %v28_v31, %v6012_v10  ;;  %v128_v42 = vrot.slane %v28_v31, %v6018_v12  ;;  %v140_v43 = vrot.slane %v29_v40, %v5997_v5 }
  0x18   :  { %5640 = vmatmul.mubr.msk.f32.vlgmr.msra.gmra.mrb[4].mxu0 %vm501_vm0, %v6038_v22  ;;  %5644 = vmatmul.mubr.msk.f32.vlgmr.msra.gmra.mrb[4].mxu1 %vm501_vm0, %v6038_v22  ;;  %vm324_vm7 = vcmp.eq.s32.totalorder %v5991_v3, %v132_v39  ;;  %v148_v44 = vrot.slane %v29_v40, %v6000_v6  ;;  %v136_v45 = vrot.slane %v29_v40, %v6003_v7 }
  0x19   :  { %732 = vmatprep.mubr.f32.mxu0 %v7807_v2  ;;  %809 = vmatprep.mubr.f32.mxu1 %v7807_v2  ;;  %vm321_vm8 = vcmp.eq.s32.totalorder %v5991_v3, %v120_v41  ;;  %vm323_vm9 = vcmp.eq.s32.totalorder %v5991_v3, %v128_v42  ;;  %vm326_vm10 = vcmp.eq.s32.totalorder %v5991_v3, %v140_v43 }
  0x1a   :  { %5647 = vmatpush1.msk.msra.mxu0 %vm309_vm11, %v5946_v23  ;;  %5651 = vmatpush1.msk.msra.mxu1 %vm311_vm12, %v5946_v23  ;;  %vm328_vm11 = vcmp.eq.s32.totalorder %v5991_v3, %v148_v44  ;;  %v144_v46 = vrot.slane %v29_v40, %v6006_v8  ;;  %v156_v47 = vrot.slane %v29_v40, %v6009_v9 }
  0x1b   :  { %5654 = vmatprep.subr.msk.mxu0 %vm314_vm13, %v5946_v23  ;;  %5658 = vmatprep.subr.msk.mxu1 %vm316_vm14, %v5946_v23  ;;  %v164_v48 = vrot.slane %v29_v40, %v6015_v11  ;;  %vm325_vm12 = vcmp.eq.s32.totalorder %v5991_v3, %v136_v45  ;;  %v152_v50 = vrot.slane %v29_v40, %v6012_v10 }
  0x1c   :  { %5641 = vmatmul.mubr.msk.f32.gmra.mrb[6].mxu0 %vm501_vm0, %v6059_v26  ;;  %5645 = vmatmul.mubr.msk.f32.gmra.mrb[6].mxu1 %vm501_vm0, %v6059_v26  ;;  %vm327_vm13 = vcmp.eq.s32.totalorder %v5991_v3, %v144_v46  ;;  %vm330_vm14 = vcmp.eq.s32.totalorder %v5991_v3, %v156_v47  ;;  %v160_v51 = vrot.slane %v29_v40, %v6018_v12 }
  0x1d   :  { %880 = vmatprep.mubr.f32.mxu0 %v7807_v2  ;;  %957 = vmatprep.mubr.f32.mxu1 %v7807_v2  ;;  %v172_v52 = vrot.slane %v30_v49, %v5997_v5  ;;  %v180_v53 = vrot.slane %v30_v49, %v6000_v6  ;;  %v168_v54 = vrot.slane %v30_v49, %v6003_v7 }
  0x1e   :  { %v176_v55 = vrot.slane %v30_v49, %v6006_v8  ;;  %v188_v56 = vrot.slane %v30_v49, %v6009_v9  ;;  %v196_v57 = vrot.slane %v30_v49, %v6015_v11  ;;  %v184_v59 = vrot.slane %v30_v49, %v6012_v10 }
  0x1f   :  { %v192_v60 = vrot.slane %v30_v49, %v6018_v12  ;;  %v204_v61 = vrot.slane %v31_v58, %v5997_v5  ;;  %v212_v62 = vrot.slane %v31_v58, %v6000_v6  ;;  %v200_v63 = vrot.slane %v31_v58, %v6003_v7 }
  0x20   :  { %5648 = vmatmul.mubr.msk.f32.vlgmr.msra.gmra.mrb[8].mxu0 %vm501_vm0, %v6038_v22  ;;  %5652 = vmatmul.mubr.msk.f32.vlgmr.msra.gmra.mrb[8].mxu1 %vm501_vm0, %v6038_v22  ;;  %v208_v0 = vrot.slane %v31_v58, %v6006_v8  ;;  %v220_v4 = vrot.slane %v31_v58, %v6009_v9  ;;  %v228_v13 = vrot.slane %v31_v58, %v6015_v11 }
  0x21   :  { %886 = vmatprep.mubr.f32.mxu0 %v7807_v2  ;;  %963 = vmatprep.mubr.f32.mxu1 %v7807_v2  ;;  %v216_v15 = vrot.slane %v31_v58, %v6012_v10  ;;  %v224_v16 = vrot.slane %v31_v58, %v6018_v12  ;;  %v236_v17 = vrot.slane %v32_v14, %v5997_v5 }
  0x22   :  { %5655 = vmatpush1.msk.msra.mxu0 %vm313_vm15, %v5946_v23  ;;  %5659 = vmatpush1.msk.msra.mxu1 %vm315_vm1, %v5946_v23  ;;  %vm332_vm15 = vcmp.eq.s32.totalorder %v5991_v3, %v164_v48  ;;  %vm329_vm1 = vcmp.eq.s32.totalorder %v5991_v3, %v152_v50  ;;  %v244_v18 = vrot.slane %v32_v14, %v6000_v6 }
  0x23   :  { %5662 = vmatprep.subr.msk.mxu0 %vm318_vm2, %v5946_v23  ;;  %5666 = vmatprep.subr.msk.mxu1 %vm320_vm3, %v5946_v23  ;;  %vm331_vm2 = vcmp.eq.s32.totalorder %v5991_v3, %v160_v51  ;;  %vm334_vm3 = vcmp.eq.s32.totalorder %v5991_v3, %v172_v52  ;;  %v232_v19 = vrot.slane %v32_v14, %v6003_v7 }
  0x24   :  { %5649 = vmatmul.mubr.msk.f32.gmra.mrb[10].mxu0 %vm501_vm0, %v6059_v26  ;;  %5653 = vmatmul.mubr.msk.f32.gmra.mrb[10].mxu1 %vm501_vm0, %v6059_v26  ;;  %v240_v20 = vrot.slane %v32_v14, %v6006_v8  ;;  %v252_v21 = vrot.slane %v32_v14, %v6009_v9  ;;  %v260_v24 = vrot.slane %v32_v14, %v6015_v11 }
  0x25   :  { %1034 = vmatprep.mubr.f32.mxu0 %v7807_v2  ;;  %1111 = vmatprep.mubr.f32.mxu1 %v7807_v2  ;;  %v248_v27 = vrot.slane %v32_v14, %v6012_v10  ;;  %v256_v28 = vrot.slane %v32_v14, %v6018_v12  ;;  %v268_v29 = vrot.slane %v33_v25, %v5997_v5  ;;  %v3119_v14 = vld [vmem:[%s7802_s3] sm:$0xff] }
  0x26   :  { %v276_v30 = vrot.slane %v33_v25, %v6000_v6  ;;  %v264_v6 = vrot.slane %v33_v25, %v6003_v7  ;;  %v272_v31 = vrot.slane %v33_v25, %v6006_v8  ;;  %v284_v32 = vrot.slane %v33_v25, %v6009_v9  ;;  %v34_v8 = vld [vmem:[%s7799_s0 + $0x40] sm:$0x3] }
  0x27   :  { %v292_v33 = vrot.slane %v33_v25, %v6015_v11  ;;  %v280_v9 = vrot.slane %v33_v25, %v6012_v10  ;;  %v288_v11 = vrot.slane %v33_v25, %v6018_v12  ;;  %v300_v34 = vrot.slane %v34_v8, %v5997_v5 }
  0x28   :  { %5656 = vmatmul.mubr.msk.f32.vlgmr.msra.gmra.mrb[12].mxu0 %vm501_vm0, %v6038_v22  ;;  %5660 = vmatmul.mubr.msk.f32.vlgmr.msra.gmra.mrb[12].mxu1 %vm501_vm0, %v6038_v22  ;;  %v296_v5 = vrot.slane %v34_v8, %v6003_v7  ;;  %v4799_v8 = vld [vmem:[%s7803_s4 + $0x10] sm:$0xff] }
  0x29   :  { %1040 = vmatprep.mubr.f32.mxu0 %v7807_v2  ;;  %1117 = vmatprep.mubr.f32.mxu1 %v7807_v2 }
  0x2a   :  { %5663 = vmatpush1.msk.msra.mxu0 %vm317_vm4, %v5946_v23  ;;  %5667 = vmatpush1.msk.msra.mxu1 %vm319_vm5, %v5946_v23  ;;  %vm336_vm4 = vcmp.eq.s32.totalorder %v5991_v3, %v180_v53  ;;  %vm333_vm5 = vcmp.eq.s32.totalorder %v5991_v3, %v168_v54 }
  0x2b   :  { %5670 = vmatprep.subr.msk.mxu0 %vm322_vm6, %v5946_v23  ;;  %5674 = vmatprep.subr.msk.mxu1 %vm324_vm7, %v5946_v23  ;;  %vm335_vm6 = vcmp.eq.s32.totalorder %v5991_v3, %v176_v55  ;;  %vm338_vm7 = vcmp.eq.s32.totalorder %v5991_v3, %v188_v56 }
  0x2c   :  { %5657 = vmatmul.mubr.msk.f32.gmra.mrb[14].mxu0 %vm501_vm0, %v6059_v26  ;;  %5661 = vmatmul.mubr.msk.f32.gmra.mrb[14].mxu1 %vm501_vm0, %v6059_v26 }
  0x2d   :  { %1188 = vmatprep.mubr.f32.mxu0 %v7807_v2  ;;  %1265 = vmatprep.mubr.f32.mxu1 %v7807_v2 }
  0x30   :  { %5664 = vmatmul.mubr.msk.f32.vlgmr.msra.gmra.mrb[16].mxu0 %vm501_vm0, %v6038_v22  ;;  %5668 = vmatmul.mubr.msk.f32.vlgmr.msra.gmra.mrb[16].mxu1 %vm501_vm0, %v6038_v22 }
  0x31   :  { %1194 = vmatprep.mubr.f32.mxu0 %v7807_v2  ;;  %1271 = vmatprep.mubr.f32.mxu1 %v7807_v2 }
  0x32   :  { %5671 = vmatpush1.msk.msra.mxu0 %vm321_vm8, %v5946_v23  ;;  %5675 = vmatpush1.msk.msra.mxu1 %vm323_vm9, %v5946_v23  ;;  %vm340_vm8 = vcmp.eq.s32.totalorder %v5991_v3, %v196_v57  ;;  %vm337_vm9 = vcmp.eq.s32.totalorder %v5991_v3, %v184_v59 }
  0x33   :  { %5678 = vmatprep.subr.msk.mxu0 %vm326_vm10, %v5946_v23  ;;  %5682 = vmatprep.subr.msk.mxu1 %vm328_vm11, %v5946_v23  ;;  %vm339_vm10 = vcmp.eq.s32.totalorder %v5991_v3, %v192_v60  ;;  %vm342_vm11 = vcmp.eq.s32.totalorder %v5991_v3, %v204_v61 }
  0x34   :  { %5665 = vmatmul.mubr.msk.f32.gmra.mrb[18].mxu0 %vm501_vm0, %v6059_v26  ;;  %5669 = vmatmul.mubr.msk.f32.gmra.mrb[18].mxu1 %vm501_vm0, %v6059_v26 }
  0x35   :  { %1342 = vmatprep.mubr.f32.mxu0 %v7807_v2  ;;  %1419 = vmatprep.mubr.f32.mxu1 %v7807_v2 }
  0x38   :  { %5672 = vmatmul.mubr.msk.f32.vlgmr.msra.gmra.mrb[20].mxu0 %vm501_vm0, %v6038_v22  ;;  %5676 = vmatmul.mubr.msk.f32.vlgmr.msra.gmra.mrb[20].mxu1 %vm501_vm0, %v6038_v22 }
  0x39   :  { %1348 = vmatprep.mubr.f32.mxu0 %v7807_v2  ;;  %1425 = vmatprep.mubr.f32.mxu1 %v7807_v2 }
  0x3a   :  { %5679 = vmatpush1.msk.msra.mxu0 %vm325_vm12, %v5946_v23  ;;  %5683 = vmatpush1.msk.msra.mxu1 %vm327_vm13, %v5946_v23  ;;  %vm344_vm12 = vcmp.eq.s32.totalorder %v5991_v3, %v212_v62  ;;  %vm341_vm13 = vcmp.eq.s32.totalorder %v5991_v3, %v200_v63 }
  0x3b   :  { %5686 = vmatprep.subr.msk.mxu0 %vm330_vm14, %v5946_v23  ;;  %5690 = vmatprep.subr.msk.mxu1 %vm332_vm15, %v5946_v23  ;;  %vm343_vm14 = vcmp.eq.s32.totalorder %v5991_v3, %v208_v0  ;;  %vm346_vm15 = vcmp.eq.s32.totalorder %v5991_v3, %v220_v4 }
  0x3c   :  { %5673 = vmatmul.mubr.msk.f32.gmra.mrb[22].mxu0 %vm501_vm0, %v6059_v26  ;;  %5677 = vmatmul.mubr.msk.f32.gmra.mrb[22].mxu1 %vm501_vm0, %v6059_v26 }
  0x3d   :  { %1496 = vmatprep.mubr.f32.mxu0 %v7807_v2  ;;  %1573 = vmatprep.mubr.f32.mxu1 %v7807_v2 }
  0x40   :  { %5680 = vmatmul.mubr.msk.f32.vlgmr.msra.gmra.mrb[24].mxu0 %vm501_vm0, %v6038_v22  ;;  %5684 = vmatmul.mubr.msk.f32.vlgmr.msra.gmra.mrb[24].mxu1 %vm501_vm0, %v6038_v22 }
  0x41   :  { %1502 = vmatprep.mubr.f32.mxu0 %v7807_v2  ;;  %1579 = vmatprep.mubr.f32.mxu1 %v7807_v2 }
  0x42   :  { %5687 = vmatpush1.msk.msra.mxu0 %vm329_vm1, %v5946_v23  ;;  %5691 = vmatpush1.msk.msra.mxu1 %vm331_vm2, %v5946_v23  ;;  %vm348_vm1 = vcmp.eq.s32.totalorder %v5991_v3, %v228_v13  ;;  %vm345_vm2 = vcmp.eq.s32.totalorder %v5991_v3, %v216_v15  ;;  %v5947_v13 = vmov 0   ;;  %v3121_v15 = vld [vmem:[%s7802_s3 + $0x10] sm:$0xff] }
  0x43   :  { %5694 = vmatprep.subr.msk.mxu0 %vm334_vm3, %v5946_v23  ;;  %5698 = vmatprep.subr.msk.mxu1 %vm336_vm4, %v5946_v23  ;;  %vm347_vm3 = vcmp.eq.s32.totalorder %v5991_v3, %v224_v16  ;;  %vm350_vm4 = vcmp.eq.s32.totalorder %v5991_v3, %v236_v17 }
  0x44   :  { %5681 = vmatmul.mubr.msk.f32.gmra.mrb[26].mxu0 %vm501_vm0, %v6059_v26  ;;  %5685 = vmatmul.mubr.msk.f32.gmra.mrb[26].mxu1 %vm501_vm0, %v6059_v26 }
  0x45   :  { %1650 = vmatprep.mubr.f32.mxu0 %v7807_v2  ;;  %1727 = vmatprep.mubr.f32.mxu1 %v7807_v2 }
  0x46   :  { %5919 = vset.pattern.permute.xlu0 %v5947_v13  ;;  %5920 = vset.pattern.permute.xlu1 %v5947_v13 }
  0x47   :  { %3125 = vperm.xlu0 %5919, %v3119_v14   ;;  %3135 = vperm.xlu1 %5920, %v3121_v15  }
  0x48   :  { %5688 = vmatmul.mubr.msk.f32.vlgmr.msra.gmra.mrb[28].mxu0 %vm501_vm0, %v6038_v22  ;;  %5692 = vmatmul.mubr.msk.f32.vlgmr.msra.gmra.mrb[28].mxu1 %vm501_vm0, %v6038_v22 }
  0x49   :  { %1656 = vmatprep.mubr.f32.mxu0 %v7807_v2  ;;  %1733 = vmatprep.mubr.f32.mxu1 %v7807_v2 }
  0x4a   :  { %5695 = vmatpush1.msk.msra.mxu0 %vm333_vm5, %v5946_v23  ;;  %5699 = vmatpush1.msk.msra.mxu1 %vm335_vm6, %v5946_v23  ;;  %vm352_vm5 = vcmp.eq.s32.totalorder %v5991_v3, %v244_v18  ;;  %vm349_vm6 = vcmp.eq.s32.totalorder %v5991_v3, %v232_v19 }
  0x4b   :  { %5702 = vmatprep.subr.msk.mxu0 %vm338_vm7, %v5946_v23  ;;  %5706 = vmatprep.subr.msk.mxu1 %vm340_vm8, %v5946_v23  ;;  %vm351_vm7 = vcmp.eq.s32.totalorder %v5991_v3, %v240_v20  ;;  %vm354_vm8 = vcmp.eq.s32.totalorder %v5991_v3, %v252_v21  ;;  %v3120_v20 = vld [vmem:[%s7802_s3 + $0x8] sm:$0xff]  ;;  %v3122_v21 = vld [vmem:[%s7802_s3 + $0x18] sm:$0xff] }
  0x4c   :  { %5689 = vmatmul.mubr.msk.f32.gmra.mrb[30].mxu0 %vm501_vm0, %v6059_v26  ;;  %5693 = vmatmul.mubr.msk.f32.gmra.mrb[30].mxu1 %vm501_vm0, %v6059_v26 }
  0x4d   :  { %1804 = vmatprep.mubr.f32.mxu0 %v7807_v2  ;;  %1881 = vmatprep.mubr.f32.mxu1 %v7807_v2 }
  0x4e   :  { %3130 = vperm.xlu0 %5919, %v3120_v20   ;;  %3140 = vperm.xlu1 %5920, %v3122_v21  }
  0x50   :  { %5696 = vmatmul.mubr.msk.f32.vlgmr.msra.gmra.mrb[32].mxu0 %vm501_vm0, %v6038_v22  ;;  %5700 = vmatmul.mubr.msk.f32.vlgmr.msra.gmra.mrb[32].mxu1 %vm501_vm0, %v6038_v22 }
  0x51   :  { %1810 = vmatprep.mubr.f32.mxu0 %v7807_v2  ;;  %1887 = vmatprep.mubr.f32.mxu1 %v7807_v2 }
  0x52   :  { %5703 = vmatpush1.msk.msra.mxu0 %vm337_vm9, %v5946_v23  ;;  %5707 = vmatpush1.msk.msra.mxu1 %vm339_vm10, %v5946_v23  ;;  %vm356_vm9 = vcmp.eq.s32.totalorder %v5991_v3, %v260_v24  ;;  %vm353_vm10 = vcmp.eq.s32.totalorder %v5991_v3, %v248_v27 }
  0x53   :  { %5710 = vmatprep.subr.msk.mxu0 %vm342_vm11, %v5946_v23  ;;  %5714 = vmatprep.subr.msk.mxu1 %vm344_vm12, %v5946_v23  ;;  %vm355_vm11 = vcmp.eq.s32.totalorder %v5991_v3, %v256_v28  ;;  %vm358_vm12 = vcmp.eq.s32.totalorder %v5991_v3, %v268_v29  ;;  %v4797_v29 = vld [vmem:[%s7803_s4] sm:$0xff] }
  0x54   :  { %5697 = vmatmul.mubr.msk.f32.gmra.mrb[34].mxu0 %vm501_vm0, %v6059_v26  ;;  %5701 = vmatmul.mubr.msk.f32.gmra.mrb[34].mxu1 %vm501_vm0, %v6059_v26 }
  0x55   :  { %1958 = vmatprep.mubr.f32.mxu0 %v7807_v2  ;;  %2035 = vmatprep.mubr.f32.mxu1 %v7807_v2 }
  0x56   :  { %4803 = vperm.xlu0 %5919, %v4797_v29  }
  0x58   :  { %5704 = vmatmul.mubr.msk.f32.vlgmr.msra.gmra.mrb[36].mxu0 %vm501_vm0, %v6038_v22  ;;  %5708 = vmatmul.mubr.msk.f32.vlgmr.msra.gmra.mrb[36].mxu1 %vm501_vm0, %v6038_v22 }
  0x59   :  { %1964 = vmatprep.mubr.f32.mxu0 %v7807_v2  ;;  %2041 = vmatprep.mubr.f32.mxu1 %v7807_v2 }
  0x5a   :  { %5711 = vmatpush1.msk.msra.mxu0 %vm341_vm13, %v5946_v23  ;;  %5715 = vmatpush1.msk.msra.mxu1 %vm343_vm14, %v5946_v23  ;;  %vm360_vm13 = vcmp.eq.s32.totalorder %v5991_v3, %v276_v30  ;;  %vm357_vm14 = vcmp.eq.s32.totalorder %v5991_v3, %v264_v6  ;;  %v4798_v30 = vld [vmem:[%s7803_s4 + $0x8] sm:$0xff] }
  0x5b   :  { %5718 = vmatprep.subr.msk.mxu0 %vm346_vm15, %v5946_v23  ;;  %5722 = vmatprep.subr.msk.mxu1 %vm348_vm1, %v5946_v23  ;;  %vm359_vm15 = vcmp.eq.s32.totalorder %v5991_v3, %v272_v31  ;;  %vm362_vm1 = vcmp.eq.s32.totalorder %v5991_v3, %v284_v32 }
  0x5c   :  { %5705 = vmatmul.mubr.msk.f32.gmra.mrb[38].mxu0 %vm501_vm0, %v6059_v26  ;;  %5709 = vmatmul.mubr.msk.f32.gmra.mrb[38].mxu1 %vm501_vm0, %v6059_v26 }
  0x5d   :  { %2112 = vmatprep.mubr.f32.mxu0 %v7807_v2  ;;  %2189 = vmatprep.mubr.f32.mxu1 %v7807_v2 }
  0x5e   :  { %4808 = vperm.xlu1 %5920, %v4798_v30   ;;  %4813 = vperm.xlu0 %5919, %v4799_v8  }
  0x60   :  { %5712 = vmatmul.mubr.msk.f32.vlgmr.msra.gmra.mrb[40].mxu0 %vm501_vm0, %v6038_v22  ;;  %5716 = vmatmul.mubr.msk.f32.vlgmr.msra.gmra.mrb[40].mxu1 %vm501_vm0, %v6038_v22 }
  0x61   :  { %2118 = vmatprep.mubr.f32.mxu0 %v7807_v2  ;;  %2195 = vmatprep.mubr.f32.mxu1 %v7807_v2 }
  0x62   :  { %5719 = vmatpush1.msk.msra.mxu0 %vm345_vm2, %v5946_v23  ;;  %5723 = vmatpush1.msk.msra.mxu1 %vm347_vm3, %v5946_v23  ;;  %vm364_vm2 = vcmp.eq.s32.totalorder %v5991_v3, %v292_v33  ;;  %vm361_vm3 = vcmp.eq.s32.totalorder %v5991_v3, %v280_v9  ;;  %v4800_v9 = vld [vmem:[%s7803_s4 + $0x18] sm:$0xff] }
  0x63   :  { %5726 = vmatprep.subr.msk.mxu0 %vm350_vm4, %v5946_v23  ;;  %5730 = vmatprep.subr.msk.mxu1 %vm352_vm5, %v5946_v23  ;;  %vm363_vm4 = vcmp.eq.s32.totalorder %v5991_v3, %v288_v11  ;;  %vm366_vm5 = vcmp.eq.s32.totalorder %v5991_v3, %v300_v34 }
  0x64   :  { %5713 = vmatmul.mubr.msk.f32.gmra.mrb[42].mxu0 %vm501_vm0, %v6059_v26  ;;  %5717 = vmatmul.mubr.msk.f32.gmra.mrb[42].mxu1 %vm501_vm0, %v6059_v26 }
  0x65   :  { %2266 = vmatprep.mubr.f32.mxu0 %v7807_v2  ;;  %2343 = vmatprep.mubr.f32.mxu1 %v7807_v2 }
  0x66   :  { %4818 = vperm.xlu1 %5920, %v4800_v9  }
  0x68   :  { %5720 = vmatmul.mubr.msk.f32.vlgmr.msra.gmra.mrb[44].mxu0 %vm501_vm0, %v6038_v22  ;;  %5724 = vmatmul.mubr.msk.f32.vlgmr.msra.gmra.mrb[44].mxu1 %vm501_vm0, %v6038_v22 }
  0x69   :  { %2272 = vmatprep.mubr.f32.mxu0 %v7807_v2  ;;  %2349 = vmatprep.mubr.f32.mxu1 %v7807_v2 }
  0x6a   :  { %5727 = vmatpush1.msk.msra.mxu0 %vm349_vm6, %v5946_v23  ;;  %5731 = vmatpush1.msk.msra.mxu1 %vm351_vm7, %v5946_v23  ;;  %vm365_vm6 = vcmp.eq.s32.totalorder %v5991_v3, %v296_v5 }
  0x6b   :  { %5734 = vmatprep.subr.msk.mxu0 %vm354_vm8, %v5946_v23  ;;  %5738 = vmatprep.subr.msk.mxu1 %vm356_vm9, %v5946_v23 }
  0x6c   :  { %5721 = vmatmul.mubr.msk.f32.gmra.mrb[46].mxu0 %vm501_vm0, %v6059_v26  ;;  %5725 = vmatmul.mubr.msk.f32.gmra.mrb[46].mxu1 %vm501_vm0, %v6059_v26 }
  0x6d   :  { %2420 = vmatprep.mubr.f32.mxu0 %v7807_v2  ;;  %2497 = vmatprep.mubr.f32.mxu1 %v7807_v2 }
  0x70   :  { %5728 = vmatmul.mubr.msk.f32.vlgmr.msra.gmra.mrb[48].mxu0 %vm501_vm0, %v6038_v22  ;;  %5732 = vmatmul.mubr.msk.f32.vlgmr.msra.gmra.mrb[48].mxu1 %vm501_vm0, %v6038_v22 }
  0x71   :  { %2426 = vmatprep.mubr.f32.mxu0 %v7807_v2  ;;  %2503 = vmatprep.mubr.f32.mxu1 %v7807_v2 }
  0x72   :  { %5735 = vmatpush1.msk.msra.mxu0 %vm353_vm10, %v5946_v23  ;;  %5739 = vmatpush1.msk.msra.mxu1 %vm355_vm11, %v5946_v23 }
  0x73   :  { %5742 = vmatprep.subr.msk.mxu0 %vm358_vm12, %v5946_v23  ;;  %5746 = vmatprep.subr.msk.mxu1 %vm360_vm13, %v5946_v23 }
  0x74   :  { %5729 = vmatmul.mubr.msk.f32.gmra.mrb[50].mxu0 %vm501_vm0, %v6059_v26  ;;  %5733 = vmatmul.mubr.msk.f32.gmra.mrb[50].mxu1 %vm501_vm0, %v6059_v26 }
  0x75   :  { %2574 = vmatprep.mubr.f32.mxu0 %v7807_v2  ;;  %2651 = vmatprep.mubr.f32.mxu1 %v7807_v2 }
  0x78   :  { %5736 = vmatmul.mubr.msk.f32.vlgmr.msra.gmra.mrb[52].mxu0 %vm501_vm0, %v6038_v22  ;;  %5740 = vmatmul.mubr.msk.f32.vlgmr.msra.gmra.mrb[52].mxu1 %vm501_vm0, %v6038_v22 }
  0x79   :  { %2580 = vmatprep.mubr.f32.mxu0 %v7807_v2  ;;  %2657 = vmatprep.mubr.f32.mxu1 %v7807_v2 }
  0x7a   :  { %5743 = vmatpush1.msk.msra.mxu0 %vm357_vm14, %v5946_v23  ;;  %5747 = vmatpush1.msk.msra.mxu1 %vm359_vm15, %v5946_v23 }
  0x7b   :  { %5750 = vmatprep.subr.msk.mxu0 %vm362_vm1, %v5946_v23  ;;  %5754 = vmatprep.subr.msk.mxu1 %vm364_vm2, %v5946_v23 }
  0x7c   :  { %5737 = vmatmul.mubr.msk.f32.gmra.mrb[54].mxu0 %vm501_vm0, %v6059_v26  ;;  %5741 = vmatmul.mubr.msk.f32.gmra.mrb[54].mxu1 %vm501_vm0, %v6059_v26 }
  0x7d   :  { %2728 = vmatprep.mubr.f32.mxu0 %v7807_v2  ;;  %2805 = vmatprep.mubr.f32.mxu1 %v7807_v2 }
  0x80   :  { %5744 = vmatmul.mubr.msk.f32.vlgmr.msra.gmra.mrb[56].mxu0 %vm501_vm0, %v6038_v22  ;;  %5748 = vmatmul.mubr.msk.f32.vlgmr.msra.gmra.mrb[56].mxu1 %vm501_vm0, %v6038_v22 }
  0x81   :  { %2734 = vmatprep.mubr.f32.mxu0 %v7807_v2  ;;  %2811 = vmatprep.mubr.f32.mxu1 %v7807_v2 }
  0x82   :  { %5751 = vmatpush1.msk.msra.mxu0 %vm361_vm3, %v5946_v23  ;;  %5755 = vmatpush1.msk.msra.mxu1 %vm363_vm4, %v5946_v23 }
  0x83   :  { %5758 = vmatprep.subr.msk.mxu0 %vm366_vm5, %v5946_v23 }
  0x84   :  { %5745 = vmatmul.mubr.msk.f32.gmra.mrb[58].mxu0 %vm501_vm0, %v6059_v26  ;;  %5749 = vmatmul.mubr.msk.f32.gmra.mrb[58].mxu1 %vm501_vm0, %v6059_v26 }
  0x85   :  { %2882 = vmatprep.mubr.f32.mxu0 %v7807_v2  ;;  %2959 = vmatprep.mubr.f32.mxu1 %v7807_v2 }
  0x88   :  { %5752 = vmatmul.mubr.msk.f32.vlgmr.msra.gmra.mrb[60].mxu0 %vm501_vm0, %v6038_v22  ;;  %5756 = vmatmul.mubr.msk.f32.vlgmr.msra.gmra.mrb[60].mxu1 %vm501_vm0, %v6038_v22 }
  0x89   :  { %2888 = vmatprep.mubr.f32.mxu0 %v7807_v2  ;;  %2965 = vmatprep.mubr.f32.mxu1 %v7807_v2 }
  0x8a   :  { %5759 = vmatpush1.msk.msra.mxu0 %vm365_vm6, %v5946_v23 }
  0x8c   :  { %5753 = vmatmul.mubr.msk.f32.gmra.mrb[62].mxu0 %vm501_vm0, %v6059_v26  ;;  %5757 = vmatmul.mubr.msk.f32.gmra.mrb[62].mxu1 %vm501_vm0, %v6059_v26 }
  0x8d   :  { %3036 = vmatprep.mubr.f32.mxu0 %v7807_v2  ;;  %3220 = vmatprep.mubr.f32.mxu1 %v7807_v2 }
  0x90   :  { %5760 = vmatmul.mubr.msk.f32.vlgmr.msra.gmra.mrb[64].mxu0 %vm501_vm0, %v6038_v22 }
  0x91   :  { %3042 = vmatprep.mubr.f32.mxu0 %v7807_v2 }
  0x94   :  { %5761 = vmatmul.mubr.msk.f32.gmra.mrb[66].mxu0 %vm501_vm0, %v6059_v26  ;;  %vm3143_vm0 = vcmask 130048  }
  0x95   :  { %3309 = vmatprep.mubr.f32.mxu0 %v7807_v2 }
  0xe3   :  { %v6450_v10 = vpop.f32.mrb[0].mxu0  ;;  %v6452_v12 = vpop.f32.mrb[0].mxu1 }
  0xe4   :  { %v6454_v23 = vpop.f32.mrb[1].mxu0  ;;  %v6456_v35 = vpop.f32.mrb[1].mxu1 }
  0xe7   :  { %v6458_v36 = vpop.f32.mrb[2].mxu0  ;;  %v6460_v37 = vpop.f32.mrb[2].mxu1 }
  0xe8   :  { %v6462_v22 = vpop.f32.mrb[3].mxu0  ;;  %v6464_v38 = vpop.f32.mrb[3].mxu1 }
  0xeb   :  { %v6466_v39 = vpop.f32.mrb[4].mxu0  ;;  %v6468_v26 = vpop.f32.mrb[4].mxu1 }
  0xec   :  { %v6470_v40 = vpop.f32.mrb[5].mxu0  ;;  %v6472_v41 = vpop.f32.mrb[5].mxu1 }
  0xef   :  { %v6474_v42 = vpop.f32.mrb[6].mxu0  ;;  %v6476_v43 = vpop.f32.mrb[6].mxu1 }
  0xf0   :  { %v6478_v44 = vpop.f32.mrb[7].mxu0  ;;  %v6480_v45 = vpop.f32.mrb[7].mxu1 }
  0xf3   :  { %v6482_v46 = vpop.f32.mrb[8].mxu0  ;;  %v6484_v47 = vpop.f32.mrb[8].mxu1 }
  0xf4   :  { %v6486_v48 = vpop.f32.mrb[9].mxu0  ;;  %v6488_v49 = vpop.f32.mrb[9].mxu1 }
  0xf7   :  { %v6490_v50 = vpop.f32.mrb[10].mxu0  ;;  %v6492_v51 = vpop.f32.mrb[10].mxu1 }
  0xf8   :  { %v6494_v52 = vpop.f32.mrb[11].mxu0  ;;  %v6496_v53 = vpop.f32.mrb[11].mxu1 }
  0xfb   :  { %v6498_v54 = vpop.f32.mrb[12].mxu0  ;;  %v6500_v55 = vpop.f32.mrb[12].mxu1 }
  0xfc   :  { %v6502_v56 = vpop.f32.mrb[13].mxu0  ;;  %v6504_v57 = vpop.f32.mrb[13].mxu1 }
  0xff   :  { %v6506_v58 = vpop.f32.mrb[14].mxu0  ;;  %v6508_v59 = vpop.f32.mrb[14].mxu1 }
 0x100   :  { %v6510_v60 = vpop.f32.mrb[15].mxu0  ;;  %v6512_v61 = vpop.f32.mrb[15].mxu1 }
 0x103   :  { %v6514_v62 = vpop.f32.mrb[16].mxu0  ;;  %v6516_v63 = vpop.f32.mrb[16].mxu1 }
 0x104   :  { %v6518_v0 = vpop.f32.mrb[17].mxu0  ;;  %v6520_v4 = vpop.f32.mrb[17].mxu1 }
 0x107   :  { %v6528_v16 = vpop.f32.mrb[18].mxu0  ;;  %v6530_v17 = vpop.f32.mrb[18].mxu1 }
 0x108   :  { %v6532_v18 = vpop.f32.mrb[19].mxu0  ;;  %v6534_v19 = vpop.f32.mrb[19].mxu1 }
 0x10b   :  { %v6542_v24 = vpop.f32.mrb[20].mxu0  ;;  %v6544_v25 = vpop.f32.mrb[20].mxu1 }
 0x10c   :  { %v6546_v27 = vpop.f32.mrb[21].mxu0  ;;  %v6548_v28 = vpop.f32.mrb[21].mxu1 }
 0x10f   :  { %v6556_v6 = vpop.f32.mrb[22].mxu0  ;;  %v6558_v31 = vpop.f32.mrb[22].mxu1 }
 0x110   :  { %v6560_v32 = vpop.f32.mrb[23].mxu0  ;;  %v6562_v33 = vpop.f32.mrb[23].mxu1 }
 0x111   :  { %7819 = vst [vmem:[#allocation8_spill] sm:$0xff] %v6562_v33 }
 0x113   :  { %v6570_v11 = vpop.f32.mrb[24].mxu0  ;;  %v6572_v34 = vpop.f32.mrb[24].mxu1 }
 0x114   :  { %7820 = vst [vmem:[#allocation9_spill] sm:$0xff] %v6570_v11  ;;  %7821 = vst [vmem:[#allocation10_spill] sm:$0xff] %v6572_v34  ;;  %v6574_v5 = vpop.f32.mrb[25].mxu0  ;;  %v6576_v13 = vpop.f32.mrb[25].mxu1 }
 0x115   :  { %7822 = vst [vmem:[#allocation11_spill] sm:$0xff] %v6576_v13  ;;  %v5250_v13 = vld [vmem:[#allocation2] sm:$0x1] }
 0x116   :  { %5253 = vperm.xlu0 %5919, %v5250_v13  }
 0x117   :  { %v6578_v14 = vpop.f32.mrb[26].mxu0  ;;  %v6580_v15 = vpop.f32.mrb[26].mxu1 }
 0x118   :  { %7823 = vst [vmem:[#allocation12_spill] sm:$0xff] %v6578_v14  ;;  %7824 = vst [vmem:[#allocation13_spill] sm:$0xff] %v6580_v15  ;;  %v6582_v20 = vpop.f32.mrb[27].mxu0  ;;  %v6584_v21 = vpop.f32.mrb[27].mxu1 }
 0x119   :  { %7825 = vst [vmem:[#allocation14_spill] sm:$0xff] %v6582_v20  ;;  %7826 = vst [vmem:[#allocation15_spill] sm:$0xff] %v6584_v21 }
 0x11b   :  { %v6586_v29 = vpop.f32.mrb[28].mxu0  ;;  %v6588_v30 = vpop.f32.mrb[28].mxu1 }
 0x11c   :  { %7827 = vst [vmem:[#allocation16_spill] sm:$0xff] %v6586_v29  ;;  %7828 = vst [vmem:[#allocation17_spill] sm:$0xff] %v6588_v30  ;;  %v6590_v8 = vpop.f32.mrb[29].mxu0  ;;  %v6592_v1 = vpop.f32.mrb[29].mxu1 }
 0x11d   :  { %7829 = vst [vmem:[#allocation18_spill] sm:$0xff] %v6590_v8  ;;  %7830 = vst [vmem:[#allocation19_spill] sm:$0xff] %v6592_v1 }
 0x11f   :  { %v6594_v9 = vpop.f32.mrb[30].mxu0  ;;  %v6596_v2 = vpop.f32.mrb[30].mxu1 }
 0x120   :  { %7831 = vst [vmem:[#allocation20_spill] sm:$0xff] %v6594_v9  ;;  %7832 = vst [vmem:[#allocation21_spill] sm:$0xff] %v6596_v2  ;;  %v6598_v7 = vpop.f32.mrb[31].mxu0  ;;  %v6600_v3 = vpop.f32.mrb[31].mxu1 }
 0x121   :  { %7833 = vst [vmem:[#allocation22_spill] sm:$0xff] %v6598_v7  ;;  %7834 = vst [vmem:[#allocation23_spill] sm:$0xff] %v6600_v3 }
 0x123   :  { %v6602_v15 = vpop.f32.mrb[32].mxu0  ;;  %v1883_v21 = vpop.f32.mrb[32].mxu1 }
 0x124   :  { %7835 = vst [vmem:[#allocation24_spill] sm:$0xff] %v6602_v15  ;;  %v3050_v29 = vmul.f32 %v1883_v21, %v6454_v23  ;;  %v1808_v30 = vpop.f32.mrb[33].mxu0  ;;  %v1885_v14 = vpop.f32.mrb[33].mxu1 }
 0x125   :  { %v3049_v8 = vmul.f32 %v1808_v30, %v6450_v10  ;;  %v3051_v1 = vmul.f32 %v1885_v14, %v6452_v12 }
 0x127   :  { %v6607_v9 = vpop.f32.mrb[34].mxu0  ;;  %v1889_v2 = vpop.f32.mrb[34].mxu1 }
 0x128   :  { %v3083_v7 = vmul.f32 %v1889_v2, %v6462_v22  ;;  %v1814_v20 = vpop.f32.mrb[35].mxu0  ;;  %v1891_v3 = vpop.f32.mrb[35].mxu1 }
 0x129   :  { %v3082_v13 = vmul.f32 %v1814_v20, %v6458_v36  ;;  %v3084_v15 = vmul.f32 %v1891_v3, %v6460_v37  ;;  %v6621_v3 = vld [vmem:[%s7801_s2] sm:$0xff] }
 0x12a   :  { %v5846_v33 = vpack.c.bf16 %v3083_v7, %v3050_v29 }
 0x12b   :  { %v5848_v34 = vpack.c.bf16 %v3082_v13, %v3049_v8  ;;  %v5852_v23 = vpack.c.bf16 %v3084_v15, %v3051_v1  ;;  %v1960_v21 = vpop.f32.mrb[36].mxu0  ;;  %v2037_v11 = vpop.f32.mrb[36].mxu1 }
 0x12c   :  { %v3052_v10 = vmul.f32 %v1960_v21, %v6456_v35  ;;  %v3054_v12 = vmul.f32 %v2037_v11, %v6470_v40  ;;  %v1962_v14 = vpop.f32.mrb[37].mxu0  ;;  %v2039_v30 = vpop.f32.mrb[37].mxu1  ;;  %5847 = vmatprep.subr.bf16.mxu1 %v5846_v33  ;;  %v7836_v33 = vmov 0.0   ;;  %v6633_v11 = vld [vmem:[%s7801_s2 + $0x8] sm:$0xff] }
 0x12d   :  { %v3053_v2 = vmul.f32 %v1962_v14, %v6466_v39  ;;  %v6616_v22 = vmul.f32 %v2039_v30, %v6468_v26  ;;  %5849 = vmatpush1.bf16.msra.mxu1 %v5848_v34 }
 0x12f   :  { %v1966_v1 = vpop.f32.mrb[38].mxu0  ;;  %v2043_v7 = vpop.f32.mrb[38].mxu1 }
 0x130   :  { %v3085_v35 = vmul.f32 %v1966_v1, %v6464_v38  ;;  %v3087_v36 = vmul.f32 %v2043_v7, %v6478_v44  ;;  %v1968_v37 = vpop.f32.mrb[39].mxu0  ;;  %v2045_v40 = vpop.f32.mrb[39].mxu1  ;;  %5762 = vmatmul.mubr.msk.f32.vlgmr.msra.gmra.mrb[64].mxu1 %vm3143_vm0, %v6621_v3 }
 0x131   :  { %v3086_v39 = vmul.f32 %v1968_v37, %v6474_v42  ;;  %v3088_v26 = vmul.f32 %v2045_v40, %v6476_v43  ;;  %3226 = vmatprep.mubr.f32.mxu1 %v7836_v33 }
 0x132   :  { %v5850_v34 = vpack.c.bf16 %v3085_v35, %v3052_v10  ;;  %v5854_v38 = vpack.c.bf16 %v3087_v36, %v3054_v12  ;;  %v6647_v12 = vld [vmem:[%s7801_s2 + $0x10] sm:$0xff] }
 0x133   :  { %v5856_v15 = vpack.c.bf16 %v3086_v39, %v3053_v2  ;;  %v5860_v44 = vpack.c.bf16 %v3088_v26, %v6616_v22  ;;  %v2114_v20 = vpop.f32.mrb[40].mxu0  ;;  %v2191_v29 = vpop.f32.mrb[40].mxu1 }
 0x134   :  { %v3056_v8 = vmul.f32 %v2114_v20, %v6472_v41  ;;  %v3058_v42 = vmul.f32 %v2191_v29, %v6486_v48  ;;  %v2116_v13 = vpop.f32.mrb[41].mxu0  ;;  %v2193_v43 = vpop.f32.mrb[41].mxu1  ;;  %5763 = vmatmul.mubr.msk.f32.gmra.mrb[66].mxu1 %vm3143_vm0, %v6633_v11  ;;  %5851 = vmatprep.subr.bf16.mxu0 %v5850_v34 }
 0x135   :  { %v3057_v21 = vmul.f32 %v2116_v13, %v6482_v46  ;;  %v6642_v10 = vmul.f32 %v2193_v43, %v6484_v47  ;;  %5855 = vmatprep.subr.bf16.mxu1 %v5854_v38  ;;  %5853 = vmatpush1.bf16.msra.mxu0 %v5852_v23 }
 0x136   :  { %5857 = vmatpush1.bf16.msra.mxu1 %v5856_v15  ;;  %3232 = vmatprep.mubr.f32.mxu1 %v7836_v33 }
 0x137   :  { %v2120_v41 = vpop.f32.mrb[42].mxu0  ;;  %v2197_v48 = vpop.f32.mrb[42].mxu1 }
 0x138   :  { %v3089_v14 = vmul.f32 %v2120_v41, %v6480_v45  ;;  %v3091_v30 = vmul.f32 %v2197_v48, %v6494_v52  ;;  %v2122_v46 = vpop.f32.mrb[43].mxu0  ;;  %v2199_v2 = vpop.f32.mrb[43].mxu1  ;;  %5764 = vmatmul.mubr.msk.f32.gmra.mrb[68].mxu1 %vm3143_vm0, %v6647_v12  ;;  %5766 = vmatmul.mubr.msk.f32.vlgmr.msra.gmra.mrb[68].mxu0 %vm3143_vm0, %v6621_v3  ;;  %v6665_v45 = vld [vmem:[%s7801_s2 + $0x18] sm:$0xff]  ;;  %s5949_s2 = smov [#allocation3]  }
 0x139   :  { %v3090_v47 = vmul.f32 %v2122_v46, %v6490_v50  ;;  %v6658_v23 = vmul.f32 %v2199_v2, %v6492_v51  ;;  %3238 = vmatprep.mubr.f32.mxu1 %v7836_v33  ;;  %3315 = vmatprep.mubr.f32.mxu0 %v7836_v33  ;;  %s5556_s14 = sshll.u32 %s5949_s2, 4  ;;  %s5557_s14 = int_to_ptr.vmem [resolvable:$true] %s5556_s14 }
 0x13a   :  { %v5858_v52 = vpack.c.bf16 %v3089_v14, %v3056_v8  ;;  %v5862_v22 = vpack.c.bf16 %v3091_v30, %v3058_v42  ;;  %s5921_s15 = scalar_lea.vmem %s5557_s14, 528  ;;  %s5925_s16 = scalar_lea.vmem %s5557_s14, 544 }
 0x13b   :  { %v5864_v1 = vpack.c.bf16 %v3090_v47, %v3057_v21  ;;  %v5868_v7 = vpack.c.bf16 %v6658_v23, %v6642_v10  ;;  %v2268_v35 = vpop.f32.mrb[44].mxu0  ;;  %v2345_v50 = vpop.f32.mrb[44].mxu1  ;;  %p5922_p0 = scmp.ne.s32.totalorder %s5557_s14, %s5921_s15  ;;  %p5926_p1 = scmp.lt.s32.totalorder %s5557_s14, %s5557_s14 }
 0x13c   :  { %v3060_v51 = vmul.f32 %v2268_v35, %v6488_v49  ;;  %v3062_v36 = vmul.f32 %v2345_v50, %v6502_v56  ;;  %v2270_v37 = vpop.f32.mrb[45].mxu0  ;;  %v2347_v40 = vpop.f32.mrb[45].mxu1  ;;  %5765 = vmatmul.mubr.msk.f32.gmra.mrb[70].mxu1 %vm3143_vm0, %v6665_v45  ;;  %5767 = vmatmul.mubr.msk.f32.gmra.mrb[70].mxu0 %vm3143_vm0, %v6633_v11  ;;  %p5927_p2 = scmp.lt.s32.totalorder %s5925_s16, %s5921_s15 }
 0x13d   :  { %v6676_v39 = vmul.f32 %v2270_v37, %v6498_v54  ;;  %v6679_v26 = vmul.f32 %v2347_v40, %v6500_v55  ;;  %5859 = vmatprep.subr.bf16.mxu0 %v5858_v52  ;;  %5863 = vmatprep.subr.bf16.mxu1 %v5862_v22 }
 0x13e   :  { %5861 = vmatpush1.bf16.msra.mxu0 %v5860_v44  ;;  %3321 = vmatprep.mubr.f32.mxu0 %v7836_v33  ;;  %p5928_p3 = por %p5927_p2, %p5926_p1 }
 0x13f   :  { %v2274_v49 = vpop.f32.mrb[46].mxu0  ;;  %v2351_v56 = vpop.f32.mrb[46].mxu1  ;;  %3398 = vmatprep.mubr.f32.mxu1 %v7836_v33 }
 0x140   :  { %v3093_v34 = vmul.f32 %v2274_v49, %v6496_v53  ;;  %v3095_v38 = vmul.f32 %v2351_v56, %v6510_v60  ;;  %v2276_v15 = vpop.f32.mrb[47].mxu0  ;;  %v2353_v20 = vpop.f32.mrb[47].mxu1  ;;  %5768 = vmatmul.mubr.msk.f32.gmra.mrb[72].mxu0 %vm3143_vm0, %v6647_v12  ;;  %5770 = vmatmul.mubr.msk.f32.vlgmr.msra.gmra.mrb[72].mxu1 %vm3143_vm0, %v6621_v3  ;;  %p5929_p4 = pnand %p5928_p3, %p5922_p0 }
 0x141   :  { %v6690_v54 = vmul.f32 %v2276_v15, %v6506_v58  ;;  %v6693_v55 = vmul.f32 %v2353_v20, %v6508_v59  ;;  %5865 = vmatpush1.bf16.msra.mxu1 %v5864_v1  ;;  %3327 = vmatprep.mubr.f32.mxu0 %v7836_v33  ;;  %v7838_v20 = vld [vmem:[#allocation10_spill] sm:$0xff] }
 0x142   :  { %v5866_v53 = vpack.c.bf16 %v3093_v34, %v3060_v51  ;;  %v5870_v44 = vpack.c.bf16 %v3095_v38, %v3062_v36  ;;  %3404 = vmatprep.mubr.f32.mxu1 %v7836_v33  ;;  %v7837_v38 = vld [vmem:[#allocation9_spill] sm:$0xff] }
 0x143   :  { %v5872_v60 = vpack.c.bf16 %v6690_v54, %v6676_v39  ;;  %v5876_v29 = vpack.c.bf16 %v6693_v55, %v6679_v26  ;;  %v2422_v8 = vpop.f32.mrb[48].mxu0  ;;  %v2499_v42 = vpop.f32.mrb[48].mxu1  ;;  %v7843_v55 = vld [vmem:[#allocation11_spill] sm:$0xff] }
 0x144   :  { %v3064_v58 = vmul.f32 %v2422_v8, %v6504_v57  ;;  %v3066_v59 = vmul.f32 %v2499_v42, %v6518_v0  ;;  %v2424_v13 = vpop.f32.mrb[49].mxu0  ;;  %v2501_v43 = vpop.f32.mrb[49].mxu1  ;;  %5769 = vmatmul.mubr.msk.f32.gmra.mrb[74].mxu0 %vm3143_vm0, %v6665_v45  ;;  %5771 = vmatmul.mubr.msk.f32.gmra.mrb[74].mxu1 %vm3143_vm0, %v6633_v11 }
 0x145   :  { %v6708_v21 = vmul.f32 %v2424_v13, %v6514_v62  ;;  %v6711_v10 = vmul.f32 %v2501_v43, %v6516_v63  ;;  %5867 = vmatprep.subr.bf16.mxu0 %v5866_v53  ;;  %5871 = vmatprep.subr.bf16.mxu1 %v5870_v44  ;;  %v7839_v53 = vld [vmem:[#allocation8_spill] sm:$0xff]  ;;  %v7842_v43 = vld [vmem:[#allocation13_spill] sm:$0xff] }
 0x146   :  { %3410 = vmatprep.mubr.f32.mxu1 %v7836_v33  ;;  %3487 = vmatprep.mubr.f32.mxu0 %v7836_v33 }
 0x147   :  { %v2428_v57 = vpop.f32.mrb[50].mxu0  ;;  %v2505_v0 = vpop.f32.mrb[50].mxu1 }
 0x148   :  { %v3097_v41 = vmul.f32 %v2428_v57, %v6512_v61  ;;  %v3099_v48 = vmul.f32 %v2505_v0, %v6532_v18  ;;  %v2430_v14 = vpop.f32.mrb[51].mxu0  ;;  %v2507_v30 = vpop.f32.mrb[51].mxu1  ;;  %5772 = vmatmul.mubr.msk.f32.gmra.mrb[76].mxu1 %vm3143_vm0, %v6647_v12  ;;  %5774 = vmatmul.mubr.msk.f32.vlgmr.msra.gmra.mrb[76].mxu0 %vm3143_vm0, %v6621_v3 }
 0x149   :  { %v6722_v62 = vmul.f32 %v2430_v14, %v6528_v16  ;;  %v6725_v63 = vmul.f32 %v2507_v30, %v6530_v17  ;;  %5869 = vmatpush1.bf16.msra.mxu0 %v5868_v7  ;;  %3416 = vmatprep.mubr.f32.mxu1 %v7836_v33 }
 0x14a   :  { %v5874_v61 = vpack.c.bf16 %v3097_v41, %v3064_v58  ;;  %v5878_v46 = vpack.c.bf16 %v3099_v48, %v3066_v59  ;;  %3493 = vmatprep.mubr.f32.mxu0 %v7836_v33  ;;  %v7841_v59 = vld [vmem:[#allocation12_spill] sm:$0xff] }
 0x14b   :  { %v5880_v18 = vpack.c.bf16 %v6722_v62, %v6708_v21  ;;  %v5884_v2 = vpack.c.bf16 %v6725_v63, %v6711_v10  ;;  %v2576_v47 = vpop.f32.mrb[52].mxu0  ;;  %v2653_v23 = vpop.f32.mrb[52].mxu1 }
 0x14c   :  { %v3068_v16 = vmul.f32 %v2576_v47, %v6520_v4  ;;  %v6735_v17 = vmul.f32 %v2653_v23, %v6546_v27  ;;  %v2578_v52 = vpop.f32.mrb[53].mxu0  ;;  %v2655_v22 = vpop.f32.mrb[53].mxu1  ;;  %5773 = vmatmul.mubr.msk.f32.gmra.mrb[78].mxu1 %vm3143_vm0, %v6665_v45  ;;  %5775 = vmatmul.mubr.msk.f32.gmra.mrb[78].mxu0 %vm3143_vm0, %v6633_v11 }
 0x14d   :  { %v6742_v1 = vmul.f32 %v2578_v52, %v6542_v24  ;;  %v6745_v7 = vmul.f32 %v2655_v22, %v6544_v25  ;;  %5875 = vmatprep.subr.bf16.mxu0 %v5874_v61  ;;  %3499 = vmatprep.mubr.f32.mxu0 %v7836_v33  ;;  %v7844_v61 = vld [vmem:[#allocation18_spill] sm:$0xff]  ;;  %v7846_v52 = vld [vmem:[#allocation17_spill] sm:$0xff] }
 0x14e   :  { %3576 = vmatprep.mubr.f32.mxu1 %v7836_v33 }
 0x14f   :  { %v2582_v4 = vpop.f32.mrb[54].mxu0  ;;  %v2659_v27 = vpop.f32.mrb[54].mxu1 }
 0x150   :  { %v3101_v35 = vmul.f32 %v2582_v4, %v6534_v19  ;;  %v6751_v50 = vmul.f32 %v2659_v27, %v6560_v32  ;;  %v2584_v51 = vpop.f32.mrb[55].mxu0  ;;  %v2661_v36 = vpop.f32.mrb[55].mxu1  ;;  %5776 = vmatmul.mubr.msk.f32.gmra.mrb[80].mxu0 %vm3143_vm0, %v6647_v12  ;;  %5778 = vmatmul.mubr.msk.f32.vlgmr.msra.gmra.mrb[80].mxu1 %vm3143_vm0, %v6621_v3 }
 0x151   :  { %v6758_v24 = vmul.f32 %v2584_v51, %v6556_v6  ;;  %v6761_v25 = vmul.f32 %v2661_v36, %v6558_v31  ;;  %5873 = vmatpush1.bf16.msra.mxu1 %v5872_v60  ;;  %3505 = vmatprep.mubr.f32.mxu0 %v7836_v33  ;;  %v7840_v60 = vld [vmem:[#allocation14_spill] sm:$0xff] }
 0x152   :  { %v5882_v19 = vpack.c.bf16 %v3101_v35, %v3068_v16  ;;  %v5886_v32 = vpack.c.bf16 %v6751_v50, %v6735_v17  ;;  %5879 = vmatprep.subr.bf16.mxu1 %v5878_v46  ;;  %3582 = vmatprep.mubr.f32.mxu1 %v7836_v33  ;;  %v7845_v16 = vld [vmem:[#allocation16_spill] sm:$0xff]  ;;  %v7847_v35 = vld [vmem:[#allocation15_spill] sm:$0xff]  ;;  %v7848_v51 = vld [vmem:[#allocation22_spill] sm:$0xff] }
 0x153   :  { %v5888_v37 = vpack.c.bf16 %v6758_v24, %v6742_v1  ;;  %v5892_v6 = vpack.c.bf16 %v6761_v25, %v6745_v7  ;;  %v2730_v40 = vpop.f32.mrb[56].mxu0  ;;  %v2807_v39 = vpop.f32.mrb[56].mxu1 }
 0x154   :  { %v6772_v31 = vmul.f32 %v2730_v40, %v6548_v28  ;;  %v6775_v49 = vmul.f32 %v2807_v39, %v6574_v5  ;;  %v2732_v56 = vpop.f32.mrb[57].mxu0  ;;  %v2809_v34 = vpop.f32.mrb[57].mxu1  ;;  %5777 = vmatmul.mubr.msk.f32.gmra.mrb[82].mxu0 %vm3143_vm0, %v6665_v45  ;;  %5779 = vmatmul.mubr.msk.f32.gmra.mrb[82].mxu1 %vm3143_vm0, %v6633_v11  ;;  %v7849_v39 = vld [vmem:[#allocation20_spill] sm:$0xff] }
 0x155   :  { %v6782_v15 = vmul.f32 %v2732_v56, %v7837_v38  ;;  %v6785_v54 = vmul.f32 %v2809_v34, %v7838_v20  ;;  %3588 = vmatprep.mubr.f32.mxu1 %v7836_v33  ;;  %3665 = vmatprep.mubr.f32.mxu0 %v7836_v33 }
 0x157   :  { %v2736_v28 = vpop.f32.mrb[58].mxu0  ;;  %v2813_v5 = vpop.f32.mrb[58].mxu1 }
 0x158   :  { %v6790_v44 = vmul.f32 %v2736_v28, %v7839_v53  ;;  %v6793_v8 = vmul.f32 %v2813_v5, %v7840_v60  ;;  %v2738_v42 = vpop.f32.mrb[59].mxu0  ;;  %v2815_v58 = vpop.f32.mrb[59].mxu1  ;;  %5780 = vmatmul.mubr.msk.f32.gmra.mrb[84].mxu1 %vm3143_vm0, %v6647_v12  ;;  %5782 = vmatmul.mubr.msk.f32.vlgmr.msra.gmra.mrb[84].mxu0 %vm3143_vm0, %v6621_v3  ;;  %v7851_v53 = vld [vmem:[#allocation19_spill] sm:$0xff] }
 0x159   :  { %v6800_v13 = vmul.f32 %v2738_v42, %v7841_v59  ;;  %v6803_v57 = vmul.f32 %v2815_v58, %v7842_v43  ;;  %5877 = vmatpush1.bf16.msra.mxu0 %v5876_v29  ;;  %3594 = vmatprep.mubr.f32.mxu1 %v7836_v33  ;;  %v7853_v60 = vld [vmem:[#allocation23_spill] sm:$0xff] }
 0x15a   :  { %v5890_v0 = vpack.c.bf16 %v6790_v44, %v6772_v31  ;;  %v5894_v41 = vpack.c.bf16 %v6793_v8, %v6775_v49  ;;  %5883 = vmatprep.subr.bf16.mxu0 %v5882_v19  ;;  %3671 = vmatprep.mubr.f32.mxu0 %v7836_v33  ;;  %v7850_v49 = vld [vmem:[#allocation21_spill] sm:$0xff] }
 0x15b   :  { %v5896_v48 = vpack.c.bf16 %v6800_v13, %v6782_v15  ;;  %v5900_v14 = vpack.c.bf16 %v6803_v57, %v6785_v54  ;;  %v2884_v30 = vpop.f32.mrb[60].mxu0  ;;  %v2961_v26 = vpop.f32.mrb[60].mxu1 }
 0x15c   :  { %v6819_v29 = vmul.f32 %v2884_v30, %v7843_v55  ;;  %v6822_v46 = vmul.f32 %v2961_v26, %v7844_v61  ;;  %v2886_v47 = vpop.f32.mrb[61].mxu0  ;;  %v2963_v23 = vpop.f32.mrb[61].mxu1  ;;  %5781 = vmatmul.mubr.msk.f32.gmra.mrb[86].mxu1 %vm3143_vm0, %v6665_v45  ;;  %5783 = vmatmul.mubr.msk.f32.gmra.mrb[86].mxu0 %vm3143_vm0, %v6633_v11 }
 0x15d   :  { %v6829_v17 = vmul.f32 %v2886_v47, %v7845_v16  ;;  %v6832_v22 = vmul.f32 %v2963_v23, %v7846_v52  ;;  %3677 = vmatprep.mubr.f32.mxu0 %v7836_v33  ;;  %3754 = vmatprep.mubr.f32.mxu1 %v7836_v33 }
 0x15f   :  { %v2890_v4 = vpop.f32.mrb[62].mxu0  ;;  %v2967_v27 = vpop.f32.mrb[62].mxu1 }
 0x160   :  { %v3109_v50 = vmul.f32 %v2890_v4, %v7847_v35  ;;  %v6838_v36 = vmul.f32 %v2967_v27, %v7848_v51  ;;  %v2892_v19 = vpop.f32.mrb[63].mxu0  ;;  %v2969_v40 = vpop.f32.mrb[63].mxu1  ;;  %5784 = vmatmul.mubr.msk.f32.gmra.mrb[88].mxu0 %vm3143_vm0, %v6647_v12  ;;  %5786 = vmatmul.mubr.msk.f32.vlgmr.msra.gmra.mrb[88].mxu1 %vm3143_vm0, %v6621_v3 }
 0x161   :  { %v6845_v31 = vmul.f32 %v2892_v19, %v7849_v39  ;;  %v6848_v56 = vmul.f32 %v2969_v40, %v7850_v49  ;;  %5881 = vmatpush1.bf16.msra.mxu1 %v5880_v18  ;;  %3683 = vmatprep.mubr.f32.mxu0 %v7836_v33  ;;  %v7852_v18 = vld [vmem:[#allocation24_spill] sm:$0xff] }
 0x162   :  { %v5898_v34 = vpack.c.bf16 %v3109_v50, %v6819_v29  ;;  %v5902_v38 = vpack.c.bf16 %v6838_v36, %v6822_v46  ;;  %5887 = vmatprep.subr.bf16.mxu1 %v5886_v32  ;;  %3760 = vmatprep.mubr.f32.mxu1 %v7836_v33 }
 0x163   :  { %v5904_v20 = vpack.c.bf16 %v6845_v31, %v6829_v17  ;;  %v5908_v28 = vpack.c.bf16 %v6848_v56, %v6832_v22  ;;  %v3038_v5 = vpop.f32.mrb[64].mxu0  ;;  %v7854_v31 = vld [vmem:[#allocation6_spill] sm:$0xff]  ;;  %v7855_v56 = vld [vmem:[#allocation7_spill] sm:$0xff] }
 0x164   :  { %v3080_v21 = vmul.f32 %v3038_v5, %v7851_v53  ;;  %v3040_v62 = vpop.f32.mrb[65].mxu0  ;;  %5785 = vmatmul.mubr.msk.f32.gmra.mrb[90].mxu0 %vm3143_vm0, %v6665_v45  ;;  %5787 = vmatmul.mubr.msk.f32.gmra.mrb[90].mxu1 %vm3143_vm0, %v6633_v11 }
 0x165   :  { %v3081_v32 = vmul.f32 %v3040_v62, %v7852_v18  ;;  %3766 = vmatprep.mubr.f32.mxu1 %v7836_v33  ;;  %3843 = vmatprep.mubr.f32.mxu0 %v7836_v33 }
 0x167   :  { %v3044_v44 = vpop.f32.mrb[66].mxu0 }
 0x168   :  { %v3113_v8 = vmul.f32 %v3044_v44, %v7853_v60  ;;  %v3046_v42 = vpop.f32.mrb[67].mxu0  ;;  %5788 = vmatmul.mubr.msk.f32.gmra.mrb[92].mxu1 %vm3143_vm0, %v6647_v12  ;;  %5790 = vmatmul.mubr.msk.f32.vlgmr.msra.gmra.mrb[92].mxu0 %vm3143_vm0, %v6621_v3 }
 0x169   :  { %v3114_v58 = vmul.f32 %v3046_v42, %v6607_v9  ;;  %5885 = vmatpush1.bf16.msra.mxu0 %v5884_v2  ;;  %3772 = vmatprep.mubr.f32.mxu1 %v7836_v33  ;;  %v7017_v9 = vpop.permute.xlu0 %3125 }
 0x16a   :  { %v5906_v59 = vpack.c.bf16 %v3113_v8, %v3080_v21  ;;  %5891 = vmatprep.subr.bf16.mxu0 %v5890_v0  ;;  %3849 = vmatprep.mubr.f32.mxu0 %v7836_v33 }
 0x16b   :  { %v6881_v43 = vpack.c.bf16 %v3114_v58, %v3081_v32 }
 0x16c   :  { %5789 = vmatmul.mubr.msk.f32.gmra.mrb[94].mxu1 %vm3143_vm0, %v6665_v45  ;;  %5791 = vmatmul.mubr.msk.f32.gmra.mrb[94].mxu0 %vm3143_vm0, %v6633_v11 }
 0x16d   :  { %3855 = vmatprep.mubr.f32.mxu0 %v7836_v33  ;;  %3932 = vmatprep.mubr.f32.mxu1 %v7836_v33  ;;  %v7021_v10 = vpop.permute.xlu0 %3130 }
 0x170   :  { %5792 = vmatmul.mubr.msk.f32.gmra.mrb[96].mxu0 %vm3143_vm0, %v6647_v12  ;;  %5794 = vmatmul.mubr.msk.f32.vlgmr.msra.gmra.mrb[96].mxu1 %vm3143_vm0, %v6621_v3 }
 0x171   :  { %5889 = vmatpush1.bf16.msra.mxu1 %v5888_v37  ;;  %3861 = vmatprep.mubr.f32.mxu0 %v7836_v33  ;;  %v7026_v1 = vpop.permute.xlu0 %4803  ;;  %v5948_v37 = vmov 1966171168  }
 0x172   :  { %5895 = vmatprep.subr.bf16.mxu1 %v5894_v41  ;;  %3938 = vmatprep.mubr.f32.mxu1 %v7836_v33 }
 0x174   :  { %5793 = vmatmul.mubr.msk.f32.gmra.mrb[98].mxu0 %vm3143_vm0, %v6665_v45  ;;  %5795 = vmatmul.mubr.msk.f32.gmra.mrb[98].mxu1 %vm3143_vm0, %v6633_v11 }
 0x175   :  { %3944 = vmatprep.mubr.f32.mxu1 %v7836_v33  ;;  %4021 = vmatprep.mubr.f32.mxu0 %v7836_v33  ;;  %v7032_v13 = vpop.permute.xlu0 %4813 }
 0x178   :  { %5796 = vmatmul.mubr.msk.f32.gmra.mrb[100].mxu1 %vm3143_vm0, %v6647_v12  ;;  %5798 = vmatmul.mubr.msk.f32.vlgmr.msra.gmra.mrb[100].mxu0 %vm3143_vm0, %v6621_v3 }
 0x179   :  { %5893 = vmatpush1.bf16.msra.mxu0 %v5892_v6  ;;  %3950 = vmatprep.mubr.f32.mxu1 %v7836_v33  ;;  %v5331_v6 = vunpack.c.l.s4 %v5948_v37 }
 0x17a   :  { %5899 = vmatprep.subr.bf16.mxu0 %v5898_v34  ;;  %4027 = vmatprep.mubr.f32.mxu0 %v7836_v33 }
 0x17b   :  { %v5332_v61 = vunpack.c.0.s8 %v5331_v6 }
 0x17c   :  { %5797 = vmatmul.mubr.msk.f32.gmra.mrb[102].mxu1 %vm3143_vm0, %v6665_v45  ;;  %5799 = vmatmul.mubr.msk.f32.gmra.mrb[102].mxu0 %vm3143_vm0, %v6633_v11 }
 0x17d   :  { %4033 = vmatprep.mubr.f32.mxu0 %v7836_v33  ;;  %4110 = vmatprep.mubr.f32.mxu1 %v7836_v33  ;;  %v7047_v49 = vsub.s32 %v5332_v61, %v7854_v31 }
 0x180   :  { %5800 = vmatmul.mubr.msk.f32.gmra.mrb[104].mxu0 %vm3143_vm0, %v6647_v12  ;;  %5802 = vmatmul.mubr.msk.f32.vlgmr.msra.gmra.mrb[104].mxu1 %vm3143_vm0, %v6621_v3 }
 0x181   :  { %5897 = vmatpush1.bf16.msra.mxu1 %v5896_v48  ;;  %4039 = vmatprep.mubr.f32.mxu0 %v7836_v33 }
 0x182   :  { %5903 = vmatprep.subr.bf16.mxu1 %v5902_v38  ;;  %4116 = vmatprep.mubr.f32.mxu1 %v7836_v33 }
 0x184   :  { %5801 = vmatmul.mubr.msk.f32.gmra.mrb[106].mxu0 %vm3143_vm0, %v6665_v45  ;;  %5803 = vmatmul.mubr.msk.f32.gmra.mrb[106].mxu1 %vm3143_vm0, %v6633_v11 }
 0x185   :  { %4122 = vmatprep.mubr.f32.mxu1 %v7836_v33  ;;  %4199 = vmatprep.mubr.f32.mxu0 %v7836_v33 }
 0x188   :  { %5804 = vmatmul.mubr.msk.f32.gmra.mrb[108].mxu1 %vm3143_vm0, %v6647_v12  ;;  %5806 = vmatmul.mubr.msk.f32.vlgmr.msra.gmra.mrb[108].mxu0 %vm3143_vm0, %v6621_v3 }
 0x189   :  { %5901 = vmatpush1.bf16.msra.mxu0 %v5900_v14  ;;  %4128 = vmatprep.mubr.f32.mxu1 %v7836_v33 }
 0x18a   :  { %5907 = vmatprep.subr.bf16.mxu0 %v5906_v59  ;;  %4205 = vmatprep.mubr.f32.mxu0 %v7836_v33 }
 0x18c   :  { %5805 = vmatmul.mubr.msk.f32.gmra.mrb[110].mxu1 %vm3143_vm0, %v6665_v45  ;;  %5807 = vmatmul.mubr.msk.f32.gmra.mrb[110].mxu0 %vm3143_vm0, %v6633_v11 }
 0x18d   :  { %4211 = vmatprep.mubr.f32.mxu0 %v7836_v33  ;;  %4288 = vmatprep.mubr.f32.mxu1 %v7836_v33 }
 0x190   :  { %5808 = vmatmul.mubr.msk.f32.gmra.mrb[112].mxu0 %vm3143_vm0, %v6647_v12  ;;  %5810 = vmatmul.mubr.msk.f32.vlgmr.msra.gmra.mrb[112].mxu1 %vm3143_vm0, %v6621_v3 }
 0x191   :  { %5905 = vmatpush1.bf16.msra.mxu1 %v5904_v20  ;;  %4217 = vmatprep.mubr.f32.mxu0 %v7836_v33 }
 0x192   :  { %5911 = vmatprep.subr.bf16.mxu1 %v6881_v43  ;;  %4294 = vmatprep.mubr.f32.mxu1 %v7836_v33 }
 0x194   :  { %5809 = vmatmul.mubr.msk.f32.gmra.mrb[114].mxu0 %vm3143_vm0, %v6665_v45  ;;  %5811 = vmatmul.mubr.msk.f32.gmra.mrb[114].mxu1 %vm3143_vm0, %v6633_v11 }
 0x195   :  { %4300 = vmatprep.mubr.f32.mxu1 %v7836_v33  ;;  %4377 = vmatprep.mubr.f32.mxu0 %v7836_v33  ;;  %v5254_v23 = vpop.permute.xlu0 %5253 }
 0x196   :  { %v7050_v34 = vrot.slane %v5254_v23, %v7855_v56 }
 0x198   :  { %5812 = vmatmul.mubr.msk.f32.gmra.mrb[116].mxu1 %vm3143_vm0, %v6647_v12  ;;  %5814 = vmatmul.mubr.msk.f32.vlgmr.msra.gmra.mrb[116].mxu0 %vm3143_vm0, %v6621_v3 }
 0x199   :  { %5909 = vmatpush1.bf16.msra.mxu0 %v5908_v28  ;;  %4306 = vmatprep.mubr.f32.mxu1 %v7836_v33 }
 0x19a   :  { %4383 = vmatprep.mubr.f32.mxu0 %v7836_v33 }
 0x19c   :  { %5813 = vmatmul.mubr.msk.f32.gmra.mrb[118].mxu1 %vm3143_vm0, %v6665_v45  ;;  %5815 = vmatmul.mubr.msk.f32.gmra.mrb[118].mxu0 %vm3143_vm0, %v6633_v11 }
 0x19d   :  { %4389 = vmatprep.mubr.f32.mxu0 %v7836_v33  ;;  %4466 = vmatprep.mubr.f32.mxu1 %v7836_v33 }
 0x1a0   :  { %5816 = vmatmul.mubr.msk.f32.gmra.mrb[120].mxu0 %vm3143_vm0, %v6647_v12  ;;  %5818 = vmatmul.mubr.msk.f32.vlgmr.msra.gmra.mrb[120].mxu1 %vm3143_vm0, %v6621_v3 }
 0x1a1   :  { %5913 = vmatpush3.bf16.msra.mxu1 %v6881_v43  ;;  %4395 = vmatprep.mubr.f32.mxu0 %v7836_v33 }
 0x1a2   :  { %4472 = vmatprep.mubr.f32.mxu1 %v7836_v33 }
 0x1a4   :  { %5817 = vmatmul.mubr.msk.f32.gmra.mrb[122].mxu0 %vm3143_vm0, %v6665_v45  ;;  %5819 = vmatmul.mubr.msk.f32.gmra.mrb[122].mxu1 %vm3143_vm0, %v6633_v11 }
 0x1a5   :  { %4478 = vmatprep.mubr.f32.mxu1 %v7836_v33  ;;  %4555 = vmatprep.mubr.f32.mxu0 %v7836_v33 }
 0x1a8   :  { %5820 = vmatmul.mubr.msk.f32.gmra.mrb[124].mxu1 %vm3143_vm0, %v6647_v12  ;;  %5822 = vmatmul.mubr.msk.f32.vlgmr.msra.gmra.mrb[124].mxu0 %vm3143_vm0, %v6621_v3 }
 0x1a9   :  { %4484 = vmatprep.mubr.f32.mxu1 %v7836_v33  ;;  %4561 = vmatprep.mubr.f32.mxu0 %v7836_v33 }
 0x1ac   :  { %5821 = vmatmul.mubr.msk.f32.gmra.mrb[126].mxu1 %vm3143_vm0, %v6665_v45  ;;  %5823 = vmatmul.mubr.msk.f32.gmra.mrb[126].mxu0 %vm3143_vm0, %v6633_v11 }
 0x1ad   :  { %4567 = vmatprep.mubr.f32.mxu0 %v7836_v33  ;;  %5840 = vmatprep.mubr.msk.f32.mxu1 %vm3143_vm0, %v6621_v3  ;;  %v7019_v3 = vpop.permute.xlu1 %3135 }
 0x1b0   :  { %5824 = vmatmul.mubr.msk.f32.gmra.mrb[128].mxu0 %vm3143_vm0, %v6647_v12  ;;  %5841 = vmatmul.mubr.msk.f32.vlgmr.msra.gmra.mrb[128].mxu1 %vm3143_vm0, %v6633_v11 }
 0x1b1   :  { %4573 = vmatprep.mubr.f32.mxu0 %v7836_v33  ;;  %5843 = vmatprep.mubr.msk.f32.mxu1 %vm3143_vm0, %v6647_v12  ;;  %v7023_v2 = vpop.permute.xlu1 %3140 }
 0x1b4   :  { %5825 = vmatmul.mubr.msk.f32.gmra.mrb[130].mxu0 %vm3143_vm0, %v6665_v45  ;;  %5844 = vmatmul.mubr.msk.f32.gmra.mrb[130].mxu1 %vm3143_vm0, %v6665_v45 }
 0x1b5   :  { %v7029_v45 = vpop.permute.xlu1 %4808 }
 0x1b9   :  { %v7044_v39 = vpop.permute.xlu1 %4818 }
 0x203   :  { %v3222_v63 = vpop.f32.mrb[64].mxu1 }
 0x204   :  { %v3223_v33 = vadd.f32 %v3222_v63, %v7017_v9  ;;  %v3224_v11 = vpop.f32.mrb[65].mxu1 }
 0x205   :  { %v3225_v15 = vadd.f32 %v3224_v11, %v7017_v9 }
 0x206   :  { %v4665_v12 = vmax.f32 %v3223_v33, 0.0 }
 0x207   :  { %v3228_v7 = vpop.f32.mrb[66].mxu1  ;;  %v4666_v46 = vmax.f32 %v3225_v15, 0.0 }
 0x208   :  { %v3229_v24 = vadd.f32 %v3228_v7, %v7021_v10  ;;  %v3230_v25 = vpop.f32.mrb[67].mxu1  ;;  %v4821_v57 = vmul.f32 %v7026_v1, %v4665_v12 }
 0x209   :  { %v3231_v17 = vadd.f32 %v3230_v25, %v7021_v10  ;;  %v7053_v28 = vmul.f32 %v7026_v1, %v4666_v46 }
 0x20a   :  { %v4698_v54 = vmax.f32 %v3229_v24, 0.0 }
 0x20b   :  { %v3234_v0 = vpop.f32.mrb[68].mxu1  ;;  %v3311_v41 = vpop.f32.mrb[68].mxu0  ;;  %7856 = vst [vmem:[#allocation9_spill] sm:$0xff] %v7053_v28  ;;  %v4699_v53 = vmax.f32 %v3231_v17, 0.0 }
 0x20c   :  { %v3235_v48 = vadd.f32 %v3234_v0, %v7019_v3  ;;  %v3312_v14 = vadd.f32 %v3311_v41, %v7017_v9  ;;  %v3236_v30 = vpop.f32.mrb[69].mxu1  ;;  %v3313_v26 = vpop.f32.mrb[69].mxu0  ;;  %v4854_v55 = vmul.f32 %v7029_v45, %v4698_v54 }
 0x20d   :  { %v3314_v29 = vadd.f32 %v3313_v26, %v7017_v9  ;;  %v7057_v62 = vadd.f32 %v3236_v30, %v7019_v3  ;;  %v7070_v41 = vmul.f32 %v7029_v45, %v4699_v53 }
 0x20e   :  { %v4731_v47 = vmax.f32 %v3235_v48, 0.0  ;;  %v4953_v16 = vadd.f32 %v4854_v55, %v4821_v57  ;;  %v4667_v52 = vmax.f32 %v3312_v14, 0.0 }
 0x20f   :  { %v3240_v22 = vpop.f32.mrb[70].mxu1  ;;  %v3317_v4 = vpop.f32.mrb[70].mxu0  ;;  %v4668_v19 = vmax.f32 %v3314_v29, 0.0  ;;  %7858 = vst [vmem:[#allocation8_spill] sm:$0xff] %v7070_v41  ;;  %v4732_v48 = vmax.f32 %v7057_v62, 0.0 }
 0x210   :  { %v3241_v27 = vadd.f32 %v3240_v22, %v7023_v2  ;;  %v3318_v35 = vadd.f32 %v3317_v4, %v7021_v10  ;;  %v3242_v50 = vpop.f32.mrb[71].mxu1  ;;  %v3319_v51 = vpop.f32.mrb[71].mxu0  ;;  %v4887_v36 = vmul.f32 %v7032_v13, %v4731_v47  ;;  %v4823_v21 = vmul.f32 %v7026_v1, %v4667_v52 }
 0x211   :  { %v3320_v40 = vadd.f32 %v3319_v51, %v7021_v10  ;;  %v4824_v63 = vmul.f32 %v7026_v1, %v4668_v19  ;;  %v7077_v61 = vadd.f32 %v3242_v50, %v7023_v2 }
 0x212   :  { %v4764_v38 = vmax.f32 %v3241_v27, 0.0  ;;  %v4700_v20 = vmax.f32 %v3318_v35, 0.0  ;;  %v4954_v5 = vadd.f32 %v4953_v16, %v4887_v36 }
 0x213   :  { %v4701_v18 = vmax.f32 %v3320_v40, 0.0  ;;  %v3323_v32 = vpop.f32.mrb[72].mxu0  ;;  %v3400_v44 = vpop.f32.mrb[72].mxu1 }
 0x214   :  { %v4856_v60 = vmul.f32 %v7029_v45, %v4700_v20  ;;  %v3324_v8 = vadd.f32 %v3323_v32, %v7019_v3  ;;  %v3325_v42 = vpop.f32.mrb[73].mxu0  ;;  %v3401_v58 = vadd.f32 %v3400_v44, %v7017_v9  ;;  %v3402_v59 = vpop.f32.mrb[73].mxu1  ;;  %v4920_v43 = vmul.f32 %v7044_v39, %v4764_v38 }
 0x215   :  { %v4857_v33 = vmul.f32 %v7029_v45, %v4701_v18  ;;  %v3326_v11 = vadd.f32 %v3325_v42, %v7019_v3  ;;  %v3403_v12 = vadd.f32 %v3402_v59, %v7017_v9 }
 0x216   :  { %v4971_v7 = vadd.f32 %v4856_v60, %v4823_v21  ;;  %v4733_v24 = vmax.f32 %v3324_v8, 0.0  ;;  %v4669_v25 = vmax.f32 %v3401_v58, 0.0  ;;  %v7067_v37 = vadd.f32 %v4954_v5, %v4920_v43 }
 0x217   :  { %v4980_v6 = vadd.f32 %v4857_v33, %v4824_v63  ;;  %v4734_v15 = vmax.f32 %v3326_v11, 0.0  ;;  %v3329_v54 = vpop.f32.mrb[74].mxu0  ;;  %v4670_v57 = vmax.f32 %v3403_v12, 0.0  ;;  %v3406_v0 = vpop.f32.mrb[74].mxu1 }
 0x218   :  { %7857 = vst [vmem:[#allocation10_spill] sm:$0xff] %v7067_v37  ;;  %v4889_v14 = vmul.f32 %v7032_v13, %v4733_v24  ;;  %v3330_v30 = vadd.f32 %v3329_v54, %v7023_v2  ;;  %v3331_v26 = vpop.f32.mrb[75].mxu0  ;;  %v3407_v55 = vadd.f32 %v3406_v0, %v7021_v10  ;;  %v3408_v29 = vpop.f32.mrb[75].mxu1  ;;  %v4825_v52 = vmul.f32 %v7026_v1, %v4669_v25 }
 0x219   :  { %v4890_v46 = vmul.f32 %v7032_v13, %v4734_v15  ;;  %v3332_v47 = vadd.f32 %v3331_v26, %v7023_v2  ;;  %v3409_v23 = vadd.f32 %v3408_v29, %v7021_v10  ;;  %v4826_v35 = vmul.f32 %v7026_v1, %v4670_v57 }
 0x21a   :  { %v4972_v16 = vadd.f32 %v4971_v7, %v4889_v14  ;;  %v4766_v17 = vmax.f32 %v3330_v30, 0.0  ;;  %v4702_v22 = vmax.f32 %v3407_v55, 0.0 }
 0x21b   :  { %v4981_v4 = vadd.f32 %v4980_v6, %v4890_v46  ;;  %v4767_v27 = vmax.f32 %v3332_v47, 0.0  ;;  %v4703_v51 = vmax.f32 %v3409_v23, 0.0  ;;  %v3412_v36 = vpop.f32.mrb[76].mxu1  ;;  %v3489_v19 = vpop.f32.mrb[76].mxu0 }
 0x21c   :  { %v4922_v50 = vmul.f32 %v7044_v39, %v4766_v17  ;;  %v4858_v40 = vmul.f32 %v7029_v45, %v4702_v22  ;;  %v3413_v31 = vadd.f32 %v3412_v36, %v7019_v3  ;;  %v3490_v56 = vadd.f32 %v3489_v19, %v7017_v9  ;;  %v3414_v38 = vpop.f32.mrb[77].mxu1  ;;  %v3491_v20 = vpop.f32.mrb[77].mxu0 }
 0x21d   :  { %v4923_v5 = vmul.f32 %v7044_v39, %v4767_v27  ;;  %v4859_v53 = vmul.f32 %v7029_v45, %v4703_v51  ;;  %v3415_v21 = vadd.f32 %v3414_v38, %v7019_v3  ;;  %v3492_v18 = vadd.f32 %v3491_v20, %v7017_v9 }
 0x21e   :  { %v4973_v32 = vadd.f32 %v4972_v16, %v4922_v50  ;;  %v4989_v44 = vadd.f32 %v4858_v40, %v4825_v52  ;;  %v4735_v60 = vmax.f32 %v3413_v31, 0.0  ;;  %v4671_v8 = vmax.f32 %v3490_v56, 0.0 }
 0x21f   :  { %v4982_v42 = vadd.f32 %v4981_v4, %v4923_v5  ;;  %v4998_v58 = vadd.f32 %v4859_v53, %v4826_v35  ;;  %v4736_v59 = vmax.f32 %v3415_v21, 0.0  ;;  %v4672_v43 = vmax.f32 %v3492_v18, 0.0  ;;  %v3418_v63 = vpop.f32.mrb[78].mxu1  ;;  %v3495_v33 = vpop.f32.mrb[78].mxu0 }
 0x220   :  { %v4974_v11 = vrot.slane %v4973_v32, 4  ;;  %v4891_v12 = vmul.f32 %v7032_v13, %v4735_v60  ;;  %v4827_v7 = vmul.f32 %v7026_v1, %v4671_v8  ;;  %v3419_v24 = vadd.f32 %v3418_v63, %v7023_v2  ;;  %v3420_v25 = vpop.f32.mrb[79].mxu1  ;;  %v3497_v6 = vpop.f32.mrb[79].mxu0 }
 0x221   :  { %v4983_v15 = vrot.slane %v4982_v42, 4  ;;  %v4892_v54 = vmul.f32 %v7032_v13, %v4736_v59  ;;  %v4828_v57 = vmul.f32 %v7026_v1, %v4672_v43  ;;  %v3496_v0 = vadd.f32 %v3495_v33, %v7021_v10 }
 0x222   :  { %v4975_v14 = vadd.f32 %v4974_v11, %v4973_v32  ;;  %v4990_v30 = vadd.f32 %v4989_v44, %v4891_v12  ;;  %v4768_v26 = vmax.f32 %v3419_v24, 0.0  ;;  %v3421_v55 = vadd.f32 %v3420_v25, %v7023_v2 }
 0x223   :  { %v4984_v29 = vadd.f32 %v4983_v15, %v4982_v42  ;;  %v4999_v46 = vadd.f32 %v4998_v58, %v4892_v54  ;;  %v4704_v47 = vmax.f32 %v3496_v0, 0.0  ;;  %v3498_v23 = vadd.f32 %v3497_v6, %v7021_v10  ;;  %v3501_v16 = vpop.f32.mrb[80].mxu0  ;;  %v3578_v17 = vpop.f32.mrb[80].mxu1 }
 0x224   :  { %v4976_v52 = vrot.slane %v4975_v14, 2  ;;  %v4924_v22 = vmul.f32 %v7044_v39, %v4768_v26  ;;  %v4769_v4 = vmax.f32 %v3421_v55, 0.0  ;;  %v3502_v27 = vadd.f32 %v3501_v16, %v7019_v3  ;;  %v3503_v35 = vpop.f32.mrb[81].mxu0  ;;  %v3580_v51 = vpop.f32.mrb[81].mxu1 }
 0x225   :  { %v4985_v36 = vrot.slane %v4984_v29, 2  ;;  %v4860_v19 = vmul.f32 %v7029_v45, %v4704_v47  ;;  %v4705_v50 = vmax.f32 %v3498_v23, 0.0  ;;  %v3504_v40 = vadd.f32 %v3503_v35, %v7019_v3 }
 0x226   :  { %v4977_v31 = vadd.f32 %v4976_v52, %v4975_v14  ;;  %v4991_v56 = vadd.f32 %v4990_v30, %v4924_v22  ;;  %v4925_v38 = vmul.f32 %v7044_v39, %v4769_v4  ;;  %v4737_v20 = vmax.f32 %v3502_v27, 0.0 }
 0x227   :  { %v4986_v5 = vadd.f32 %v4985_v36, %v4984_v29  ;;  %v5007_v53 = vadd.f32 %v4860_v19, %v4827_v7  ;;  %v4861_v21 = vmul.f32 %v7029_v45, %v4705_v50  ;;  %v4738_v18 = vmax.f32 %v3504_v40, 0.0  ;;  %v3507_v32 = vpop.f32.mrb[82].mxu0  ;;  %v3584_v44 = vpop.f32.mrb[82].mxu1 }
 0x228   :  { %v4978_v60 = vrot.slane %v4977_v31, 1  ;;  %v4992_v8 = vrot.slane %v4991_v56, 4  ;;  %v5000_v42 = vadd.f32 %v4999_v46, %v4925_v38  ;;  %v4893_v58 = vmul.f32 %v7032_v13, %v4737_v20  ;;  %v3509_v59 = vpop.f32.mrb[83].mxu0  ;;  %v3586_v43 = vpop.f32.mrb[83].mxu1 }
 0x229   :  { %v4987_v63 = vrot.slane %v4986_v5, 1  ;;  %v5016_v33 = vadd.f32 %v4861_v21, %v4828_v57  ;;  %v4894_v11 = vmul.f32 %v7032_v13, %v4738_v18  ;;  %v3508_v12 = vadd.f32 %v3507_v32, %v7023_v2 }
 0x22a   :  { %v4979_v24 = vadd.f32 %v4978_v60, %v4977_v31  ;;  %v4993_v7 = vadd.f32 %v4992_v8, %v4991_v56  ;;  %v5001_v25 = vrot.slane %v5000_v42, 4  ;;  %v5008_v6 = vadd.f32 %v5007_v53, %v4893_v58 }
 0x22b   :  { %v4988_v15 = vadd.f32 %v4987_v63, %v4986_v5  ;;  %v5017_v54 = vadd.f32 %v5016_v33, %v4894_v11  ;;  %v4770_v0 = vmax.f32 %v3508_v12, 0.0  ;;  %v3510_v14 = vadd.f32 %v3509_v59, %v7023_v2  ;;  %v3590_v30 = vpop.f32.mrb[84].mxu1  ;;  %v3667_v26 = vpop.f32.mrb[84].mxu0 }
 0x22c   :  { %v4994_v55 = vrot.slane %v4993_v7, 2  ;;  %v5002_v29 = vadd.f32 %v5001_v25, %v5000_v42  ;;  %v7111_v46 = vadd.f32 %v7050_v34, %v4979_v24  ;;  %v3579_v57 = vadd.f32 %v3578_v17, %v7017_v9  ;;  %v3592_v47 = vpop.f32.mrb[85].mxu1  ;;  %v3669_v23 = vpop.f32.mrb[85].mxu0 }
 0x22d   :  { %v7115_v16 = vadd.f32 %v7050_v34, %v4988_v15  ;;  %v4926_v52 = vmul.f32 %v7044_v39, %v4770_v0  ;;  %v4771_v22 = vmax.f32 %v3510_v14, 0.0  ;;  %v3581_v4 = vadd.f32 %v3580_v51, %v7017_v9 }
 0x22e   :  { %7859 = vst [vmem:[#allocation14_spill] sm:$0xff] %v7111_v46  ;;  %v4995_v27 = vadd.f32 %v4994_v55, %v4993_v7  ;;  %v5003_v35 = vrot.slane %v5002_v29, 2  ;;  %v4673_v36 = vmax.f32 %v3579_v57, 0.0  ;;  %v3585_v19 = vadd.f32 %v3584_v44, %v7021_v10 }
 0x22f   :  { %7860 = vst [vmem:[#allocation12_spill] sm:$0xff] %v7115_v16  ;;  %v5009_v40 = vadd.f32 %v5008_v6, %v4926_v52  ;;  %v4927_v17 = vmul.f32 %v7044_v39, %v4771_v22  ;;  %v4674_v31 = vmax.f32 %v3581_v4, 0.0  ;;  %v3596_v56 = vpop.f32.mrb[86].mxu1  ;;  %v3673_v38 = vpop.f32.mrb[86].mxu0  ;;  %v7128_v8 = vmul.f32 %v7032_v13, %v4732_v48 }
 0x230   :  { %v4996_v20 = vrot.slane %v4995_v27, 1  ;;  %v5004_v5 = vadd.f32 %v5003_v35, %v5002_v29  ;;  %v4829_v53 = vmul.f32 %v7026_v1, %v4673_v36  ;;  %v4706_v21 = vmax.f32 %v3585_v19, 0.0  ;;  %v3598_v51 = vpop.f32.mrb[87].mxu1  ;;  %v3675_v18 = vpop.f32.mrb[87].mxu0 }
 0x231   :  { %v5010_v32 = vrot.slane %v5009_v40, 4  ;;  %v5018_v60 = vadd.f32 %v5017_v54, %v4927_v17  ;;  %v4830_v44 = vmul.f32 %v7026_v1, %v4674_v31  ;;  %7861 = vst [vmem:[#allocation13_spill] sm:$0xff] %v7128_v8  ;;  %v3587_v63 = vadd.f32 %v3586_v43, %v7021_v10 }
 0x232   :  { %v4997_v42 = vadd.f32 %v4996_v20, %v4995_v27  ;;  %v5005_v58 = vrot.slane %v5004_v5, 1  ;;  %v4862_v59 = vmul.f32 %v7029_v45, %v4706_v21  ;;  %v3591_v12 = vadd.f32 %v3590_v30, %v7019_v3 }
 0x233   :  { %v5011_v33 = vadd.f32 %v5010_v32, %v5009_v40  ;;  %v5019_v11 = vrot.slane %v5018_v60, 4  ;;  %v3668_v24 = vadd.f32 %v3667_v26, %v7017_v9  ;;  %v3679_v7 = vpop.f32.mrb[88].mxu0  ;;  %v7134_v25 = vpop.f32.mrb[88].mxu1  ;;  %v4707_v15 = vmax.f32 %v3587_v63, 0.0 }
 0x234   :  { %v5006_v6 = vadd.f32 %v5005_v58, %v5004_v5  ;;  %v7137_v62 = vadd.f32 %v7050_v34, %v4997_v42  ;;  %v5025_v48 = vadd.f32 %v4862_v59, %v4829_v53  ;;  %v3681_v54 = vpop.f32.mrb[89].mxu0  ;;  %v7139_v0 = vpop.f32.mrb[89].mxu1  ;;  %v4739_v55 = vmax.f32 %v3591_v12, 0.0 }
 0x235   :  { %v5012_v14 = vrot.slane %v5011_v33, 2  ;;  %v5020_v43 = vadd.f32 %v5019_v11, %v5018_v60  ;;  %v4675_v29 = vmax.f32 %v3668_v24, 0.0  ;;  %v4863_v26 = vmul.f32 %v7029_v45, %v4707_v15 }
 0x236   :  { %v7142_v30 = vadd.f32 %v7050_v34, %v5006_v6  ;;  %v3593_v57 = vadd.f32 %v3592_v47, %v7019_v3  ;;  %v3670_v52 = vadd.f32 %v3669_v23, %v7017_v9  ;;  %v4765_v22 = vmax.f32 %v7077_v61, 0.0 }
 0x237   :  { %v5013_v4 = vadd.f32 %v5012_v14, %v5011_v33  ;;  %v5021_v27 = vrot.slane %v5020_v43, 2  ;;  %v4895_v35 = vmul.f32 %v7032_v13, %v4739_v55  ;;  %v3685_v36 = vpop.f32.mrb[90].mxu0  ;;  %v7149_v19 = vpop.f32.mrb[90].mxu1  ;;  %v5034_v17 = vadd.f32 %v4863_v26, %v4830_v44 }
 0x238   :  { %v4740_v31 = vmax.f32 %v3593_v57, 0.0  ;;  %v4676_v20 = vmax.f32 %v3670_v52, 0.0  ;;  %v3687_v5 = vpop.f32.mrb[91].mxu0  ;;  %v7153_v53 = vpop.f32.mrb[91].mxu1  ;;  %v3597_v32 = vadd.f32 %v3596_v56, %v7023_v2  ;;  %v4831_v60 = vmul.f32 %v7026_v1, %v4675_v29 }
 0x239   :  { %v5014_v47 = vrot.slane %v5013_v4, 1  ;;  %v5022_v23 = vadd.f32 %v5021_v27, %v5020_v43  ;;  %v5026_v21 = vadd.f32 %v5025_v48, %v4895_v35  ;;  %v3674_v59 = vadd.f32 %v3673_v38, %v7021_v10 }
 0x23a   :  { %v4896_v42 = vmul.f32 %v7032_v13, %v4740_v31  ;;  %v4832_v58 = vmul.f32 %v7026_v1, %v4676_v20  ;;  %v4772_v33 = vmax.f32 %v3597_v32, 0.0  ;;  %v3599_v11 = vadd.f32 %v3598_v51, %v7023_v2 }
 0x23b   :  { %v5015_v63 = vadd.f32 %v5014_v47, %v5013_v4  ;;  %v5023_v44 = vrot.slane %v5022_v23, 1  ;;  %v7161_v12 = vpop.f32.mrb[92].mxu1  ;;  %v7163_v24 = vpop.f32.mrb[92].mxu0  ;;  %v4708_v48 = vmax.f32 %v3674_v59, 0.0  ;;  %v3676_v56 = vadd.f32 %v3675_v18, %v7021_v10 }
 0x23c   :  { %v5035_v6 = vadd.f32 %v5034_v17, %v4896_v42  ;;  %v3680_v15 = vadd.f32 %v3679_v7, %v7019_v3  ;;  %v7167_v14 = vpop.f32.mrb[93].mxu1  ;;  %v7169_v43 = vpop.f32.mrb[93].mxu0  ;;  %v4928_v51 = vmul.f32 %v7044_v39, %v4772_v33  ;;  %v4773_v29 = vmax.f32 %v3599_v11, 0.0 }
 0x23d   :  { %v7172_v38 = vadd.f32 %v7050_v34, %v5015_v63  ;;  %v5024_v55 = vadd.f32 %v5023_v44, %v5022_v23  ;;  %v4864_v26 = vmul.f32 %v7029_v45, %v4708_v48  ;;  %v4709_v57 = vmax.f32 %v3676_v56, 0.0 }
 0x23e   :  { %v4741_v52 = vmax.f32 %v3680_v15, 0.0  ;;  %v3682_v4 = vadd.f32 %v3681_v54, %v7019_v3  ;;  %v5027_v7 = vadd.f32 %v5026_v21, %v4928_v51  ;;  %v4929_v27 = vmul.f32 %v7044_v39, %v4773_v29 }
 0x23f   :  { %v7178_v18 = vadd.f32 %v7050_v34, %v5024_v55  ;;  %v3686_v35 = vadd.f32 %v3685_v36, %v7023_v2  ;;  %v7182_v17 = vpop.f32.mrb[94].mxu1  ;;  %v7184_v31 = vpop.f32.mrb[94].mxu0  ;;  %v5043_v20 = vadd.f32 %v4864_v26, %v4831_v60  ;;  %v4865_v47 = vmul.f32 %v7029_v45, %v4709_v57 }
 0x240   :  { %v4897_v23 = vmul.f32 %v7032_v13, %v4741_v52  ;;  %v4742_v32 = vmax.f32 %v3682_v4, 0.0  ;;  %v7188_v42 = vpop.f32.mrb[95].mxu1  ;;  %v7190_v54 = vpop.f32.mrb[95].mxu0  ;;  %v5028_v59 = vrot.slane %v5027_v7, 4  ;;  %v5036_v63 = vadd.f32 %v5035_v6, %v4929_v27 }
 0x241   :  { %v4774_v36 = vmax.f32 %v3686_v35, 0.0  ;;  %v5052_v44 = vadd.f32 %v4865_v47, %v4832_v58  ;;  %v3688_v60 = vadd.f32 %v3687_v5, %v7023_v2  ;;  %v7204_v29 = vmul.f32 %v7044_v39, %v4765_v22 }
 0x242   :  { %v5044_v33 = vadd.f32 %v5043_v20, %v4897_v23  ;;  %v4898_v11 = vmul.f32 %v7032_v13, %v4742_v32  ;;  %v5029_v48 = vadd.f32 %v5028_v59, %v5027_v7  ;;  %v5037_v56 = vrot.slane %v5036_v63, 4 }
 0x243   :  { %v4930_v15 = vmul.f32 %v7044_v39, %v4774_v36  ;;  %v7197_v55 = vpop.f32.mrb[96].mxu0  ;;  %v7199_v51 = vpop.f32.mrb[96].mxu1  ;;  %7862 = vst [vmem:[#allocation11_spill] sm:$0xff] %v7204_v29  ;;  %v4775_v58 = vmax.f32 %v3688_v60, 0.0  ;;  %v3757_v26 = vadd.f32 %v7134_v25, %v7017_v9  ;;  %v3759_v5 = vadd.f32 %v7139_v0, %v7017_v9 }
 0x244   :  { %v5053_v6 = vadd.f32 %v5052_v44, %v4898_v11  ;;  %v7210_v57 = vpop.f32.mrb[97].mxu0  ;;  %v7212_v52 = vpop.f32.mrb[97].mxu1  ;;  %v5030_v4 = vrot.slane %v5029_v48, 2  ;;  %v5038_v7 = vadd.f32 %v5037_v56, %v5036_v63  ;;  %v3763_v61 = vadd.f32 %v7149_v19, %v7021_v10 }
 0x245   :  { %v5045_v27 = vadd.f32 %v5044_v33, %v4930_v15  ;;  %v4931_v22 = vmul.f32 %v7044_v39, %v4775_v58  ;;  %v4677_v35 = vmax.f32 %v3757_v26, 0.0  ;;  %v4678_v20 = vmax.f32 %v3759_v5, 0.0 }
 0x246   :  { %v3765_v25 = vadd.f32 %v7153_v53, %v7021_v10  ;;  %v5031_v47 = vadd.f32 %v5030_v4, %v5029_v48  ;;  %v5039_v23 = vrot.slane %v5038_v7, 2  ;;  %v4710_v32 = vmax.f32 %v3763_v61, 0.0 }
 0x247   :  { %v5046_v0 = vrot.slane %v5045_v27, 4  ;;  %v7219_v59 = vpop.f32.mrb[98].mxu0  ;;  %v7221_v36 = vpop.f32.mrb[98].mxu1  ;;  %v5054_v63 = vadd.f32 %v5053_v6, %v4931_v22  ;;  %v4833_v44 = vmul.f32 %v7026_v1, %v4677_v35  ;;  %v4834_v19 = vmul.f32 %v7026_v1, %v4678_v20 }
 0x248   :  { %v4711_v33 = vmax.f32 %v3765_v25, 0.0  ;;  %v7225_v11 = vpop.f32.mrb[99].mxu0  ;;  %v7227_v60 = vpop.f32.mrb[99].mxu1  ;;  %v5032_v56 = vrot.slane %v5031_v47, 1  ;;  %v5040_v53 = vadd.f32 %v5039_v23, %v5038_v7  ;;  %v4866_v15 = vmul.f32 %v7029_v45, %v4710_v32 }
 0x249   :  { %v5047_v48 = vadd.f32 %v5046_v0, %v5045_v27  ;;  %v5055_v58 = vrot.slane %v5054_v63, 4  ;;  %v3769_v6 = vadd.f32 %v7161_v12, %v7019_v3  ;;  %v3846_v5 = vadd.f32 %v7163_v24, %v7017_v9 }
 0x24a   :  { %v4867_v26 = vmul.f32 %v7029_v45, %v4711_v33  ;;  %v5033_v4 = vadd.f32 %v5032_v56, %v5031_v47  ;;  %v5041_v61 = vrot.slane %v5040_v53, 1  ;;  %v5061_v35 = vadd.f32 %v4866_v15, %v4833_v44 }
 0x24b   :  { %v5048_v22 = vrot.slane %v5047_v48, 2  ;;  %v7235_v20 = vpop.f32.mrb[100].mxu1  ;;  %v7237_v25 = vpop.f32.mrb[100].mxu0  ;;  %v5056_v7 = vadd.f32 %v5055_v58, %v5054_v63  ;;  %v4743_v23 = vmax.f32 %v3769_v6, 0.0  ;;  %v3771_v44 = vadd.f32 %v7167_v14, %v7019_v3 }
 0x24c   :  { %v5070_v27 = vadd.f32 %v4867_v26, %v4834_v19  ;;  %v7239_v0 = vpop.f32.mrb[101].mxu1  ;;  %v7241_v32 = vpop.f32.mrb[101].mxu0  ;;  %v7245_v33 = vadd.f32 %v7050_v34, %v5033_v4  ;;  %v5042_v24 = vadd.f32 %v5041_v61, %v5040_v53  ;;  %v4679_v63 = vmax.f32 %v3846_v5, 0.0 }
 0x24d   :  { %v5049_v47 = vadd.f32 %v5048_v22, %v5047_v48  ;;  %v5057_v56 = vrot.slane %v5056_v7, 2  ;;  %v4899_v15 = vmul.f32 %v7032_v13, %v4743_v23  ;;  %v3848_v19 = vadd.f32 %v7169_v43, %v7017_v9 }
 0x24e   :  { %v7253_v58 = vadd.f32 %v7050_v34, %v5042_v24  ;;  %v4744_v6 = vmax.f32 %v3771_v44, 0.0  ;;  %v3775_v4 = vadd.f32 %v7182_v17, %v7023_v2  ;;  %v3852_v5 = vadd.f32 %v7184_v31, %v7021_v10 }
 0x24f   :  { %v5050_v26 = vrot.slane %v5049_v47, 1  ;;  %v7257_v53 = vpop.f32.mrb[102].mxu1  ;;  %v7259_v48 = vpop.f32.mrb[102].mxu0  ;;  %v5058_v14 = vadd.f32 %v5057_v56, %v5056_v7  ;;  %v5062_v61 = vadd.f32 %v5061_v35, %v4899_v15  ;;  %v4680_v22 = vmax.f32 %v3848_v19, 0.0 }
 0x250   :  { %v7263_v23 = vpop.f32.mrb[103].mxu1  ;;  %v7265_v43 = vpop.f32.mrb[103].mxu0  ;;  %v4900_v17 = vmul.f32 %v7032_v13, %v4744_v6  ;;  %v4776_v50 = vmax.f32 %v3775_v4, 0.0  ;;  %v4835_v21 = vmul.f32 %v7026_v1, %v4679_v63  ;;  %v4712_v7 = vmax.f32 %v3852_v5, 0.0 }
 0x251   :  { %v5051_v44 = vadd.f32 %v5050_v26, %v5049_v47  ;;  %v5059_v12 = vrot.slane %v5058_v14, 1  ;;  %v3777_v35 = vadd.f32 %v7188_v42, %v7023_v2  ;;  %v4836_v15 = vmul.f32 %v7026_v1, %v4680_v22 }
 0x252   :  { %v5071_v56 = vadd.f32 %v5070_v27, %v4900_v17  ;;  %v4932_v19 = vmul.f32 %v7044_v39, %v4776_v50  ;;  %v4868_v6 = vmul.f32 %v7029_v45, %v4712_v7  ;;  %v3854_v4 = vadd.f32 %v7190_v54, %v7021_v10 }
 0x253   :  { %v7274_v31 = vadd.f32 %v7050_v34, %v5051_v44  ;;  %v7278_v24 = vpop.f32.mrb[104].mxu0  ;;  %v7280_v47 = vpop.f32.mrb[104].mxu1  ;;  %v5060_v26 = vadd.f32 %v5059_v12, %v5058_v14  ;;  %v4777_v63 = vmax.f32 %v3777_v35, 0.0  ;;  %v3858_v22 = vadd.f32 %v7197_v55, %v7019_v3 }
 0x254   :  { %v7285_v42 = vpop.f32.mrb[105].mxu0  ;;  %v7287_v5 = vpop.f32.mrb[105].mxu1  ;;  %v5063_v27 = vadd.f32 %v5062_v61, %v4932_v19  ;;  %v3860_v50 = vadd.f32 %v7210_v57, %v7019_v3  ;;  %v3864_v12 = vadd.f32 %v7219_v59, %v7023_v2  ;;  %v5079_v44 = vadd.f32 %v4868_v6, %v4835_v21 }
 0x255   :  { %v7296_v14 = vadd.f32 %v7050_v34, %v5060_v26  ;;  %v4933_v54 = vmul.f32 %v7044_v39, %v4777_v63  ;;  %v4713_v17 = vmax.f32 %v3854_v4, 0.0  ;;  %v4745_v35 = vmax.f32 %v3858_v22, 0.0 }
 0x256   :  { %v5064_v7 = vrot.slane %v5063_v27, 4  ;;  %v4746_v40 = vmax.f32 %v3860_v50, 0.0  ;;  %v4778_v61 = vmax.f32 %v3864_v12, 0.0  ;;  %v3866_v21 = vadd.f32 %v7225_v11, %v7023_v2 }
 0x257   :  { %v7299_v19 = vpop.f32.mrb[106].mxu0  ;;  %v7301_v55 = vpop.f32.mrb[106].mxu1  ;;  %v5072_v16 = vadd.f32 %v5071_v56, %v4933_v54  ;;  %v4869_v59 = vmul.f32 %v7029_v45, %v4713_v17  ;;  %v4901_v4 = vmul.f32 %v7032_v13, %v4745_v35  ;;  %v7863_v56 = vcombine.low %v7137_v62, %v7142_v30 }
 0x258   :  { %v7308_v26 = vpop.f32.mrb[107].mxu0  ;;  %v7310_v6 = vpop.f32.mrb[107].mxu1  ;;  %v5065_v63 = vadd.f32 %v5064_v7, %v5063_v27  ;;  %v4902_v22 = vmul.f32 %v7032_v13, %v4746_v40  ;;  %v4934_v50 = vmul.f32 %v7044_v39, %v4778_v61  ;;  %v4779_v11 = vmax.f32 %v3866_v21, 0.0 }
 0x259   :  { %v7319_v12 = vrot.slane %v7863_v56, %v7047_v49  ;;  %v5073_v54 = vrot.slane %v5072_v16, 4  ;;  %v5088_v17 = vadd.f32 %v4869_v59, %v4836_v15  ;;  %v5080_v46 = vadd.f32 %v5079_v44, %v4901_v4 }
 0x25a   :  { %v5066_v57 = vrot.slane %v5065_v63, 2  ;;  %v3935_v27 = vadd.f32 %v7199_v51, %v7017_v9  ;;  %v3937_v7 = vadd.f32 %v7212_v52, %v7017_v9  ;;  %v4935_v62 = vmul.f32 %v7044_v39, %v4779_v11 }
 0x25b   :  { %7864 = vst [vmem:[#allocation18_spill] sm:$0xff] %v7319_v12  ;;  %v7325_v40 = vpop.f32.mrb[108].mxu1  ;;  %v7327_v35 = vpop.f32.mrb[108].mxu0  ;;  %v5074_v61 = vadd.f32 %v5073_v54, %v5072_v16  ;;  %v5089_v29 = vadd.f32 %v5088_v17, %v4902_v22  ;;  %v3941_v30 = vadd.f32 %v7221_v36, %v7021_v10  ;;  %v5081_v51 = vadd.f32 %v5080_v46, %v4934_v50 }
 0x25c   :  { %v7332_v15 = vpop.f32.mrb[109].mxu1  ;;  %v7334_v44 = vpop.f32.mrb[109].mxu0  ;;  %v5067_v59 = vadd.f32 %v5066_v57, %v5065_v63  ;;  %v4681_v21 = vmax.f32 %v3935_v27, 0.0  ;;  %v4682_v4 = vmax.f32 %v3937_v7, 0.0  ;;  %v3943_v16 = vadd.f32 %v7227_v60, %v7021_v10 }
 0x25d   :  { %v5075_v52 = vrot.slane %v5074_v61, 2  ;;  %v5090_v56 = vadd.f32 %v5089_v29, %v4935_v62  ;;  %v4714_v8 = vmax.f32 %v3941_v30, 0.0  ;;  %v5082_v54 = vrot.slane %v5081_v51, 4 }
 0x25e   :  { %v5068_v22 = vrot.slane %v5067_v59, 1  ;;  %v4837_v17 = vmul.f32 %v7026_v1, %v4681_v21  ;;  %v4838_v36 = vmul.f32 %v7026_v1, %v4682_v4  ;;  %v4715_v50 = vmax.f32 %v3943_v16, 0.0 }
 0x25f   :  { %v7340_v11 = vpop.f32.mrb[110].mxu1  ;;  %v7342_v12 = vpop.f32.mrb[110].mxu0  ;;  %v5076_v57 = vadd.f32 %v5075_v52, %v5074_v61  ;;  %v5091_v46 = vrot.slane %v5090_v56, 4  ;;  %v4870_v63 = vmul.f32 %v7029_v45, %v4714_v8  ;;  %v5083_v7 = vadd.f32 %v5082_v54, %v5081_v51 }
 0x260   :  { %v7345_v29 = vpop.f32.mrb[111].mxu1  ;;  %v7347_v27 = vpop.f32.mrb[111].mxu0  ;;  %v5069_v60 = vadd.f32 %v5068_v22, %v5067_v59  ;;  %v3947_v62 = vadd.f32 %v7235_v20, %v7019_v3  ;;  %v4024_v30 = vadd.f32 %v7237_v25, %v7017_v9  ;;  %v4871_v61 = vmul.f32 %v7029_v45, %v4715_v50 }
 0x261   :  { %v5077_v21 = vrot.slane %v5076_v57, 1  ;;  %v5092_v4 = vadd.f32 %v5091_v46, %v5090_v56  ;;  %v5097_v41 = vadd.f32 %v4870_v63, %v4837_v17  ;;  %v7865_v8 = vcombine.low %v7172_v38, %v7178_v18 }
 0x262   :  { %v7361_v59 = vadd.f32 %v7050_v34, %v5069_v60  ;;  %v5084_v51 = vrot.slane %v5083_v7, 2  ;;  %v4747_v16 = vmax.f32 %v3947_v62, 0.0  ;;  %v5106_v54 = vadd.f32 %v4871_v61, %v4838_v36 }
 0x263   :  { %v7358_v52 = vrot.slane %v7865_v8, %v7047_v49  ;;  %v7363_v20 = vpop.f32.mrb[112].mxu0  ;;  %v7365_v22 = vpop.f32.mrb[112].mxu1  ;;  %v5078_v25 = vadd.f32 %v5077_v21, %v5076_v57  ;;  %v5093_v56 = vrot.slane %v5092_v4, 2  ;;  %v3949_v17 = vadd.f32 %v7239_v0, %v7019_v3 }
 0x264   :  { %v7369_v46 = vpop.f32.mrb[113].mxu0  ;;  %v7371_v38 = vpop.f32.mrb[113].mxu1  ;;  %v5085_v18 = vadd.f32 %v5084_v51, %v5083_v7  ;;  %v4903_v63 = vmul.f32 %v7032_v13, %v4747_v16  ;;  %v4683_v50 = vmax.f32 %v4024_v30, 0.0  ;;  %v4026_v60 = vadd.f32 %v7241_v32, %v7017_v9 }
 0x265   :  { %7866 = vst [vmem:[#allocation16_spill] sm:$0xff] %v7358_v52  ;;  %v7377_v62 = vadd.f32 %v7050_v34, %v5078_v25  ;;  %v5094_v57 = vadd.f32 %v5093_v56, %v5092_v4  ;;  %v4748_v21 = vmax.f32 %v3949_v17, 0.0  ;;  %v3953_v36 = vadd.f32 %v7257_v53, %v7023_v2 }
 0x266   :  { %v5086_v0 = vrot.slane %v5085_v18, 1  ;;  %v5098_v61 = vadd.f32 %v5097_v41, %v4903_v63  ;;  %v4684_v8 = vmax.f32 %v4026_v60, 0.0  ;;  %v4030_v7 = vadd.f32 %v7259_v48, %v7021_v10 }
 0x267   :  { %v7383_v51 = vpop.f32.mrb[114].mxu0  ;;  %v7385_v30 = vpop.f32.mrb[114].mxu1  ;;  %v5095_v16 = vrot.slane %v5094_v57, 1  ;;  %v4904_v4 = vmul.f32 %v7032_v13, %v4748_v21  ;;  %v4780_v25 = vmax.f32 %v3953_v36, 0.0  ;;  %v4839_v17 = vmul.f32 %v7026_v1, %v4683_v50 }
 0x268   :  { %v7390_v56 = vpop.f32.mrb[115].mxu0  ;;  %v7392_v53 = vpop.f32.mrb[115].mxu1  ;;  %v5087_v41 = vadd.f32 %v5086_v0, %v5085_v18  ;;  %v4716_v63 = vmax.f32 %v4030_v7, 0.0  ;;  %v3955_v48 = vadd.f32 %v7263_v23, %v7023_v2  ;;  %v4840_v28 = vmul.f32 %v7026_v1, %v4684_v8 }
 0x269   :  { %v5096_v60 = vadd.f32 %v5095_v16, %v5094_v57  ;;  %v5107_v52 = vadd.f32 %v5106_v54, %v4904_v4  ;;  %v4936_v32 = vmul.f32 %v7044_v39, %v4780_v25  ;;  %v4032_v18 = vadd.f32 %v7265_v43, %v7021_v10 }
 0x26a   :  { %v7400_v21 = vadd.f32 %v7050_v34, %v5087_v41  ;;  %v4872_v36 = vmul.f32 %v7029_v45, %v4716_v63  ;;  %v4781_v37 = vmax.f32 %v3955_v48, 0.0  ;;  %v4036_v57 = vadd.f32 %v7278_v24, %v7019_v3 }
 0x26b   :  { %v7405_v50 = vpop.f32.mrb[116].mxu1  ;;  %v7407_v0 = vpop.f32.mrb[116].mxu0  ;;  %v7410_v23 = vadd.f32 %v7050_v34, %v5096_v60  ;;  %v5099_v54 = vadd.f32 %v5098_v61, %v4936_v32  ;;  %v4038_v8 = vadd.f32 %v7285_v42, %v7019_v3  ;;  %v4717_v25 = vmax.f32 %v4032_v18, 0.0 }
 0x26c   :  { %v7416_v7 = vpop.f32.mrb[117].mxu1  ;;  %v7418_v16 = vpop.f32.mrb[117].mxu0  ;;  %v5115_v4 = vadd.f32 %v4872_v36, %v4839_v17  ;;  %v4937_v43 = vmul.f32 %v7044_v39, %v4781_v37  ;;  %v4042_v41 = vadd.f32 %v7299_v19, %v7023_v2  ;;  %v4749_v63 = vmax.f32 %v4036_v57, 0.0 }
 0x26d   :  { %7867 = vst [vmem:[#allocation17_spill] sm:$0xff] %v7418_v16  ;;  %v5100_v32 = vrot.slane %v5099_v54, 4  ;;  %v4750_v24 = vmax.f32 %v4038_v8, 0.0  ;;  %v4873_v42 = vmul.f32 %v7029_v45, %v4717_v25  ;;  %v4044_v16 = vadd.f32 %v7308_v26, %v7023_v2 }
 0x26e   :  { %v5108_v48 = vadd.f32 %v5107_v52, %v4937_v43  ;;  %v4782_v60 = vmax.f32 %v4042_v41, 0.0  ;;  %v7870_v19 = vcombine.low %v7245_v33, %v7253_v58  ;;  %v4905_v57 = vmul.f32 %v7032_v13, %v4749_v63 }
 0x26f   :  { %v7428_v17 = vpop.f32.mrb[118].mxu1  ;;  %v7430_v37 = vpop.f32.mrb[118].mxu0  ;;  %v5101_v18 = vadd.f32 %v5100_v32, %v5099_v54  ;;  %v4906_v52 = vmul.f32 %v7032_v13, %v4750_v24  ;;  %v5124_v25 = vadd.f32 %v4873_v42, %v4840_v28  ;;  %v4783_v61 = vmax.f32 %v4044_v16, 0.0 }
 0x270   :  { %7868 = vst [vmem:[#allocation15_spill] sm:$0xff] %v7428_v17  ;;  %7869 = vst [vmem:[#allocation22_spill] sm:$0xff] %v7430_v37  ;;  %v7436_v36 = vrot.slane %v7870_v19, %v7047_v49  ;;  %v7440_v8 = vpop.f32.mrb[119].mxu1  ;;  %v7442_v43 = vpop.f32.mrb[119].mxu0  ;;  %v5109_v26 = vrot.slane %v5108_v48, 4  ;;  %v4938_v41 = vmul.f32 %v7044_v39, %v4782_v60  ;;  %v5116_v17 = vadd.f32 %v5115_v4, %v4905_v57 }
 0x271   :  { %v5102_v37 = vrot.slane %v5101_v18, 2  ;;  %v4113_v33 = vadd.f32 %v7280_v47, %v7017_v9  ;;  %v4115_v58 = vadd.f32 %v7287_v5, %v7017_v9  ;;  %v5125_v32 = vadd.f32 %v5124_v25, %v4906_v52 }
 0x272   :  { %7871 = vst [vmem:[#allocation20_spill] sm:$0xff] %v7436_v36  ;;  %v5110_v54 = vadd.f32 %v5109_v26, %v5108_v48  ;;  %v4939_v63 = vmul.f32 %v7044_v39, %v4783_v61  ;;  %v4119_v24 = vadd.f32 %v7301_v55, %v7021_v10  ;;  %v5117_v42 = vadd.f32 %v5116_v17, %v4938_v41 }
 0x273   :  { %v7452_v19 = vpop.f32.mrb[120].mxu0  ;;  %v7454_v28 = vpop.f32.mrb[120].mxu1  ;;  %v5103_v16 = vadd.f32 %v5102_v37, %v5101_v18  ;;  %v4685_v4 = vmax.f32 %v4113_v33, 0.0  ;;  %v4686_v60 = vmax.f32 %v4115_v58, 0.0  ;;  %v4121_v61 = vadd.f32 %v7310_v6, %v7021_v10 }
 0x274   :  { %v7456_v57 = vpop.f32.mrb[121].mxu0  ;;  %v7458_v47 = vpop.f32.mrb[121].mxu1  ;;  %v5111_v5 = vrot.slane %v5110_v54, 2  ;;  %v5126_v48 = vadd.f32 %v5125_v32, %v4939_v63  ;;  %v4718_v52 = vmax.f32 %v4119_v24, 0.0  ;;  %v5118_v55 = vrot.slane %v5117_v42, 4 }
 0x275   :  { %7872 = vst [vmem:[#allocation21_spill] sm:$0xff] %v7458_v47  ;;  %v5104_v26 = vrot.slane %v5103_v16, 1  ;;  %v4841_v25 = vmul.f32 %v7026_v1, %v4685_v4  ;;  %v4842_v36 = vmul.f32 %v7026_v1, %v4686_v60  ;;  %v4719_v41 = vmax.f32 %v4121_v61, 0.0 }
 0x276   :  { %v5112_v37 = vadd.f32 %v5111_v5, %v5110_v54  ;;  %v5127_v17 = vrot.slane %v5126_v48, 4  ;;  %v4874_v18 = vmul.f32 %v7029_v45, %v4718_v52  ;;  %v5119_v63 = vadd.f32 %v5118_v55, %v5117_v42 }
 0x277   :  { %v7465_v33 = vpop.f32.mrb[122].mxu0  ;;  %v7467_v58 = vpop.f32.mrb[122].mxu1  ;;  %v5105_v32 = vadd.f32 %v5104_v26, %v5103_v16  ;;  %v4125_v6 = vadd.f32 %v7325_v40, %v7019_v3  ;;  %v4202_v24 = vadd.f32 %v7327_v35, %v7017_v9  ;;  %v4875_v61 = vmul.f32 %v7029_v45, %v4719_v41 }
 0x278   :  { %7873 = vst [vmem:[#allocation19_spill] sm:$0xff] %v7467_v58  ;;  %v7473_v4 = vpop.f32.mrb[123].mxu0  ;;  %v7475_v60 = vpop.f32.mrb[123].mxu1  ;;  %v5113_v54 = vrot.slane %v5112_v37, 1  ;;  %v5128_v5 = vadd.f32 %v5127_v17, %v5126_v48  ;;  %v5133_v52 = vadd.f32 %v4874_v18, %v4841_v25  ;;  %v7874_v16 = vcombine.low %v7274_v31, %v7296_v14 }
 0x279   :  { %v7485_v40 = vadd.f32 %v7050_v34, %v5105_v32  ;;  %v5120_v26 = vrot.slane %v5119_v63, 2  ;;  %v4751_v35 = vmax.f32 %v4125_v6, 0.0  ;;  %v5142_v47 = vadd.f32 %v4875_v61, %v4842_v36 }
 0x27a   :  { %v7482_v42 = vrot.slane %v7874_v16, %v7047_v49  ;;  %v5114_v55 = vadd.f32 %v5113_v54, %v5112_v37  ;;  %v5129_v58 = vrot.slane %v5128_v5, 2  ;;  %v4127_v48 = vadd.f32 %v7332_v15, %v7019_v3 }
 0x27b   :  { %v7489_v25 = vpop.f32.mrb[124].mxu1  ;;  %v7491_v17 = vpop.f32.mrb[124].mxu0  ;;  %v5121_v18 = vadd.f32 %v5120_v26, %v5119_v63  ;;  %v4907_v31 = vmul.f32 %v7032_v13, %v4751_v35  ;;  %v4687_v14 = vmax.f32 %v4202_v24, 0.0  ;;  %v4204_v41 = vadd.f32 %v7334_v44, %v7017_v9 }
 0x27c   :  { %7875 = vst [vmem:[#allocation24_spill] sm:$0xff] %v7482_v42  ;;  %v7496_v32 = vpop.f32.mrb[125].mxu1  ;;  %v7498_v6 = vpop.f32.mrb[125].mxu0  ;;  %v7501_v36 = vadd.f32 %v7050_v34, %v5114_v55  ;;  %v5130_v37 = vadd.f32 %v5129_v58, %v5128_v5  ;;  %v4752_v15 = vmax.f32 %v4127_v48, 0.0  ;;  %v4131_v54 = vadd.f32 %v7340_v11, %v7023_v2 }
 0x27d   :  { %v5122_v61 = vrot.slane %v5121_v18, 1  ;;  %v5134_v63 = vadd.f32 %v5133_v52, %v4907_v31  ;;  %v4688_v16 = vmax.f32 %v4204_v41, 0.0  ;;  %v4208_v24 = vadd.f32 %v7342_v12, %v7021_v10 }
 0x27e   :  { %v5131_v26 = vrot.slane %v5130_v37, 1  ;;  %v4908_v35 = vmul.f32 %v7032_v13, %v4752_v15  ;;  %v4784_v42 = vmax.f32 %v4131_v54, 0.0  ;;  %v4843_v11 = vmul.f32 %v7026_v1, %v4687_v14 }
 0x27f   :  { %v7510_v55 = vpop.f32.mrb[126].mxu1  ;;  %v7512_v58 = vpop.f32.mrb[126].mxu0  ;;  %v5123_v5 = vadd.f32 %v5122_v61, %v5121_v18  ;;  %v4720_v48 = vmax.f32 %v4208_v24, 0.0  ;;  %v4133_v52 = vadd.f32 %v7345_v29, %v7023_v2  ;;  %v4844_v15 = vmul.f32 %v7026_v1, %v4688_v16 }
 0x280   :  { %7876 = vst [vmem:[#allocation23_spill] sm:$0xff] %v7510_v55  ;;  %v7517_v31 = vpop.f32.mrb[127].mxu1  ;;  %v7519_v12 = vpop.f32.mrb[127].mxu0  ;;  %v5132_v41 = vadd.f32 %v5131_v26, %v5130_v37  ;;  %v5143_v44 = vadd.f32 %v5142_v47, %v4908_v35  ;;  %v4940_v54 = vmul.f32 %v7044_v39, %v4784_v42  ;;  %v4210_v61 = vadd.f32 %v7347_v27, %v7021_v10 }
 0x281   :  { %v7524_v55 = vadd.f32 %v7050_v34, %v5123_v5  ;;  %v4876_v18 = vmul.f32 %v7029_v45, %v4720_v48  ;;  %v4785_v14 = vmax.f32 %v4133_v52, 0.0  ;;  %v4214_v47 = vadd.f32 %v7363_v20, %v7019_v3 }
 0x282   :  { %v7530_v29 = vadd.f32 %v7050_v34, %v5132_v41  ;;  %v5135_v24 = vadd.f32 %v5134_v63, %v4940_v54  ;;  %v4216_v37 = vadd.f32 %v7369_v46, %v7019_v3  ;;  %v4721_v5 = vmax.f32 %v4210_v61, 0.0 }
 0x283   :  { %v7536_v42 = vpop.f32.mrb[128].mxu0  ;;  %v7538_v16 = vpop.f32.mrb[128].mxu1  ;;  %v5151_v26 = vadd.f32 %v4876_v18, %v4843_v11  ;;  %v4941_v35 = vmul.f32 %v7044_v39, %v4785_v14  ;;  %v4220_v27 = vadd.f32 %v7383_v51, %v7023_v2  ;;  %v4753_v46 = vmax.f32 %v4214_v47, 0.0 }
 0x284   :  { %7877 = vst [vmem:[#allocation6_spill] sm:$0xff] %v7538_v16  ;;  %v7543_v48 = vpop.f32.mrb[129].mxu0  ;;  %v7545_v63 = vpop.f32.mrb[129].mxu1  ;;  %v5136_v52 = vrot.slane %v5135_v24, 4  ;;  %v4754_v41 = vmax.f32 %v4216_v37, 0.0  ;;  %v4877_v16 = vmul.f32 %v7029_v45, %v4721_v5  ;;  %v4222_v18 = vadd.f32 %v7390_v56, %v7023_v2 }
 0x285   :  { %7878 = vst [vmem:[#allocation7_spill] sm:$0xff] %v7543_v48  ;;  %7879 = vst [vmem:[#allocation25_spill] sm:$0xff] %v7545_v63  ;;  %v5144_v54 = vadd.f32 %v5143_v44, %v4941_v35  ;;  %v4786_v11 = vmax.f32 %v4220_v27, 0.0  ;;  %v7880_v51 = vcombine.low %v7361_v59, %v7377_v62  ;;  %v4909_v63 = vmul.f32 %v7032_v13, %v4753_v46 }
 0x286   :  { %v5137_v61 = vadd.f32 %v5136_v52, %v5135_v24  ;;  %v4910_v20 = vmul.f32 %v7032_v13, %v4754_v41  ;;  %v5160_v35 = vadd.f32 %v4877_v16, %v4844_v15  ;;  %v4787_v56 = vmax.f32 %v4222_v18, 0.0 }
 0x287   :  { %v7556_v14 = vrot.slane %v7880_v51, %v7047_v49  ;;  %v7560_v47 = vpop.f32.mrb[130].mxu0  ;;  %v7562_v44 = vpop.f32.mrb[130].mxu1  ;;  %v5145_v37 = vrot.slane %v5144_v54, 4  ;;  %v4942_v5 = vmul.f32 %v7044_v39, %v4786_v11  ;;  %v5152_v62 = vadd.f32 %v5151_v26, %v4909_v63 }
 0x288   :  { %7882 = vst [vmem:[#allocation27_spill] sm:$0xff] %v7562_v44  ;;  %v7565_v27 = vpop.f32.mrb[131].mxu0  ;;  %v7567_v48 = vpop.f32.mrb[131].mxu1  ;;  %v5138_v59 = vrot.slane %v5137_v61, 2  ;;  %v4291_v24 = vadd.f32 %v7365_v22, %v7017_v9  ;;  %v4293_v52 = vadd.f32 %v7371_v38, %v7017_v9  ;;  %v5161_v41 = vadd.f32 %v5160_v35, %v4910_v20 }
 0x289   :  { %7881 = vst [vmem:[#allocation26_spill] sm:$0xff] %v7556_v14  ;;  %7883 = vst [vmem:[#allocation28_spill] sm:$0xff] %v7565_v27  ;;  %v5146_v46 = vadd.f32 %v5145_v37, %v5144_v54  ;;  %v4943_v51 = vmul.f32 %v7044_v39, %v4787_v56  ;;  %v4297_v15 = vadd.f32 %v7385_v30, %v7021_v10 }
 0x28a   :  { %7884 = vst [vmem:[#allocation29_spill] sm:$0xff] %v7567_v48  ;;  %v5139_v16 = vadd.f32 %v5138_v59, %v5137_v61  ;;  %v5153_v11 = vadd.f32 %v5152_v62, %v4942_v5  ;;  %v4689_v18 = vmax.f32 %v4291_v24, 0.0  ;;  %v4690_v14 = vmax.f32 %v4293_v52, 0.0 }
 0x28b   :  { %v5147_v48 = vrot.slane %v5146_v46, 2  ;;  %v5162_v27 = vadd.f32 %v5161_v41, %v4943_v51  ;;  %v4722_v26 = vmax.f32 %v4297_v15, 0.0  ;;  %v4299_v22 = vadd.f32 %v7392_v53, %v7021_v10 }
 0x28c   :  { %v5140_v63 = vrot.slane %v5139_v16, 1  ;;  %v5154_v44 = vrot.slane %v5153_v11, 4  ;;  %v4845_v38 = vmul.f32 %v7026_v1, %v4689_v18  ;;  %v4846_v20 = vmul.f32 %v7026_v1, %v4690_v14  ;;  %v7886_v18 = vld [vmem:[#allocation17_spill] sm:$0xff] }
 0x28d   :  { %v5148_v54 = vadd.f32 %v5147_v48, %v5146_v46  ;;  %v5163_v37 = vrot.slane %v5162_v27, 4  ;;  %v4878_v30 = vmul.f32 %v7029_v45, %v4722_v26  ;;  %v4723_v61 = vmax.f32 %v4299_v22, 0.0 }
 0x28e   :  { %v5141_v35 = vadd.f32 %v5140_v63, %v5139_v16  ;;  %v5155_v5 = vadd.f32 %v5154_v44, %v5153_v11  ;;  %v4303_v56 = vadd.f32 %v7405_v50, %v7019_v3  ;;  %v4380_v59 = vadd.f32 %v7407_v0, %v7017_v9  ;;  %v7887_v63 = vld [vmem:[#allocation15_spill] sm:$0xff] }
 0x28f   :  { %v5149_v53 = vrot.slane %v5148_v54, 1  ;;  %v5164_v62 = vadd.f32 %v5163_v37, %v5162_v27  ;;  %v5169_v24 = vadd.f32 %v4878_v30, %v4845_v38  ;;  %v4879_v52 = vmul.f32 %v7029_v45, %v4723_v61 }
 0x290   :  { %v7885_v48 = vcombine.low %v7400_v21, %v7410_v23  ;;  %v7593_v46 = vadd.f32 %v7050_v34, %v5141_v35  ;;  %v5156_v44 = vrot.slane %v5155_v5, 2  ;;  %v4755_v41 = vmax.f32 %v4303_v56, 0.0 }
 0x291   :  { %v5150_v50 = vadd.f32 %v5149_v53, %v5148_v54  ;;  %v5165_v51 = vrot.slane %v5164_v62, 2  ;;  %v5178_v15 = vadd.f32 %v4879_v52, %v4846_v20  ;;  %v4305_v0 = vadd.f32 %v7416_v7, %v7019_v3  ;;  %v7888_v7 = vld [vmem:[#allocation22_spill] sm:$0xff] }
 0x292   :  { %v7590_v14 = vrot.slane %v7885_v48, %v7047_v49  ;;  %v5157_v27 = vadd.f32 %v5156_v44, %v5155_v5  ;;  %v4911_v16 = vmul.f32 %v7032_v13, %v4755_v41  ;;  %v4691_v11 = vmax.f32 %v4380_v59, 0.0 }
 0x293   :  { %v4382_v21 = vadd.f32 %v7886_v18, %v7017_v9  ;;  %v7601_v23 = vadd.f32 %v7050_v34, %v5150_v50  ;;  %v5166_v26 = vadd.f32 %v5165_v51, %v5164_v62  ;;  %v4756_v22 = vmax.f32 %v4305_v0, 0.0 }
 0x294   :  { %v4309_v38 = vadd.f32 %v7887_v63, %v7023_v2  ;;  %v5158_v54 = vrot.slane %v5157_v27, 1  ;;  %v5170_v20 = vadd.f32 %v5169_v24, %v4911_v16  ;;  %v4386_v30 = vadd.f32 %v7888_v7, %v7021_v10 }
 0x295   :  { %v4692_v37 = vmax.f32 %v4382_v21, 0.0  ;;  %v5426_v61 = vcombine.low %v7593_v46, %v7601_v23  ;;  %v5167_v35 = vrot.slane %v5166_v26, 1  ;;  %v4912_v5 = vmul.f32 %v7032_v13, %v4756_v22 }
 0x296   :  { %v4788_v56 = vmax.f32 %v4309_v38, 0.0  ;;  %v5159_v59 = vadd.f32 %v5158_v54, %v5157_v27  ;;  %v4847_v53 = vmul.f32 %v7026_v1, %v4691_v11  ;;  %v4724_v62 = vmax.f32 %v4386_v30, 0.0 }
 0x297   :  { %v4311_v52 = vadd.f32 %v7440_v8, %v7023_v2  ;;  %v5168_v48 = vadd.f32 %v5167_v35, %v5166_v26  ;;  %v5179_v24 = vadd.f32 %v5178_v15, %v4912_v5  ;;  %v4848_v44 = vmul.f32 %v7026_v1, %v4692_v37 }
 0x298   :  { %v4944_v41 = vmul.f32 %v7044_v39, %v4788_v56  ;;  %v7616_v50 = vadd.f32 %v7050_v34, %v5159_v59  ;;  %v4880_v51 = vmul.f32 %v7029_v45, %v4724_v62  ;;  %v4388_v27 = vadd.f32 %v7442_v43, %v7021_v10 }
 0x299   :  { %v4789_v0 = vmax.f32 %v4311_v52, 0.0  ;;  %v7622_v16 = vadd.f32 %v7050_v34, %v5168_v48  ;;  %v4392_v8 = vadd.f32 %v7452_v19, %v7019_v3  ;;  %v4394_v15 = vadd.f32 %v7456_v57, %v7019_v3 }
 0x29a   :  { %v5171_v11 = vadd.f32 %v5170_v20, %v4944_v41  ;;  %v5187_v18 = vadd.f32 %v4880_v51, %v4847_v53  ;;  %v4725_v26 = vmax.f32 %v4388_v27, 0.0  ;;  %v4398_v22 = vadd.f32 %v7465_v33, %v7023_v2 }
 0x29b   :  { %v4945_v21 = vmul.f32 %v7044_v39, %v4789_v0  ;;  %v5427_v43 = vcombine.low %v7616_v50, %v7622_v16  ;;  %v4757_v38 = vmax.f32 %v4392_v8, 0.0  ;;  %v4758_v54 = vmax.f32 %v4394_v15, 0.0  ;;  %v7891_v0 = vld [vmem:[#allocation19_spill] sm:$0xff] }
 0x29c   :  { %v5172_v63 = vrot.slane %v5171_v11, 4  ;;  %v4881_v37 = vmul.f32 %v7029_v45, %v4725_v26  ;;  %v4790_v19 = vmax.f32 %v4398_v22, 0.0  ;;  %v4400_v57 = vadd.f32 %v7473_v4, %v7023_v2 }
 0x29d   :  { %v5180_v20 = vadd.f32 %v5179_v24, %v4945_v21  ;;  %v7889_v7 = vcombine.low %v7485_v40, %v7501_v36  ;;  %v4913_v35 = vmul.f32 %v7032_v13, %v4757_v38  ;;  %v4914_v5 = vmul.f32 %v7032_v13, %v4758_v54  ;;  %v7890_v24 = vld [vmem:[#allocation21_spill] sm:$0xff] }
 0x29e   :  { %v5173_v33 = vadd.f32 %v5172_v63, %v5171_v11  ;;  %v5196_v59 = vadd.f32 %v4881_v37, %v4848_v44  ;;  %v4946_v53 = vmul.f32 %v7044_v39, %v4790_v19  ;;  %v4791_v62 = vmax.f32 %v4400_v57, 0.0 }
 0x29f   :  { %v7640_v30 = vrot.slane %v7889_v7, %v7047_v49  ;;  %v5181_v56 = vrot.slane %v5180_v20, 4  ;;  %v5188_v48 = vadd.f32 %v5187_v18, %v4913_v35  ;;  %v4469_v4 = vadd.f32 %v7454_v28, %v7017_v9 }
 0x2a0   :  { %v5174_v52 = vrot.slane %v5173_v33, 2  ;;  %v4471_v40 = vadd.f32 %v7890_v24, %v7017_v9  ;;  %v5197_v41 = vadd.f32 %v5196_v59, %v4914_v5  ;;  %v4947_v51 = vmul.f32 %v7044_v39, %v4791_v62 }
 0x2a1   :  { %v5182_v36 = vadd.f32 %v5181_v56, %v5180_v20  ;;  %v4475_v27 = vadd.f32 %v7891_v0, %v7021_v10  ;;  %v5189_v44 = vadd.f32 %v5188_v48, %v4946_v53  ;;  %v4693_v8 = vmax.f32 %v4469_v4, 0.0 }
 0x2a2   :  { %v5175_v11 = vadd.f32 %v5174_v52, %v5173_v33  ;;  %v4694_v15 = vmax.f32 %v4471_v40, 0.0  ;;  %v5198_v26 = vadd.f32 %v5197_v41, %v4947_v51  ;;  %v4477_v28 = vadd.f32 %v7475_v60, %v7021_v10 }
 0x2a3   :  { %v5183_v21 = vrot.slane %v5182_v36, 2  ;;  %v4726_v18 = vmax.f32 %v4475_v27, 0.0  ;;  %v5190_v63 = vrot.slane %v5189_v44, 4  ;;  %v4849_v38 = vmul.f32 %v7026_v1, %v4693_v8 }
 0x2a4   :  { %v5176_v22 = vrot.slane %v5175_v11, 1  ;;  %v4850_v54 = vmul.f32 %v7026_v1, %v4694_v15  ;;  %v5199_v37 = vrot.slane %v5198_v26, 4  ;;  %v4727_v57 = vmax.f32 %v4477_v28, 0.0 }
 0x2a5   :  { %v5184_v20 = vadd.f32 %v5183_v21, %v5182_v36  ;;  %v4882_v19 = vmul.f32 %v7029_v45, %v4726_v18  ;;  %v5191_v33 = vadd.f32 %v5190_v63, %v5189_v44  ;;  %v4481_v35 = vadd.f32 %v7489_v25, %v7019_v3  ;;  %v7893_v44 = vld [vmem:[#allocation23_spill] sm:$0xff] }
 0x2a6   :  { %v5177_v7 = vadd.f32 %v5176_v22, %v5175_v11  ;;  %v4558_v5 = vadd.f32 %v7491_v17, %v7017_v9  ;;  %v5200_v56 = vadd.f32 %v5199_v37, %v5198_v26  ;;  %v4883_v53 = vmul.f32 %v7029_v45, %v4727_v57 }
 0x2a7   :  { %v5185_v60 = vrot.slane %v5184_v20, 1  ;;  %v5205_v59 = vadd.f32 %v4882_v19, %v4849_v38  ;;  %v7892_v62 = vcombine.low %v7524_v55, %v7530_v29  ;;  %v5192_v4 = vrot.slane %v5191_v33, 2 }
 0x2a8   :  { %v7669_v48 = vadd.f32 %v7050_v34, %v5177_v7  ;;  %v4759_v24 = vmax.f32 %v4481_v35, 0.0  ;;  %v5201_v40 = vrot.slane %v5200_v56, 2  ;;  %v5214_v36 = vadd.f32 %v4883_v53, %v4850_v54 }
 0x2a9   :  { %v7666_v52 = vrot.slane %v7892_v62, %v7047_v49  ;;  %v5186_v25 = vadd.f32 %v5185_v60, %v5184_v20  ;;  %v4483_v17 = vadd.f32 %v7496_v32, %v7019_v3  ;;  %v5193_v41 = vadd.f32 %v5192_v4, %v5191_v33 }
 0x2aa   :  { %v4915_v51 = vmul.f32 %v7032_v13, %v4759_v24  ;;  %v4695_v0 = vmax.f32 %v4558_v5, 0.0  ;;  %v4560_v55 = vadd.f32 %v7498_v6, %v7017_v9  ;;  %v5202_v27 = vadd.f32 %v5201_v40, %v5200_v56 }
 0x2ab   :  { %v7677_v29 = vadd.f32 %v7050_v34, %v5186_v25  ;;  %v4760_v11 = vmax.f32 %v4483_v17, 0.0  ;;  %v4487_v8 = vadd.f32 %v7893_v44, %v7023_v2  ;;  %v5194_v15 = vrot.slane %v5193_v41, 1  ;;  %v7895_v25 = vld [vmem:[#allocation7_spill] sm:$0xff] }
 0x2ac   :  { %v5206_v21 = vadd.f32 %v5205_v59, %v4915_v51  ;;  %v4696_v26 = vmax.f32 %v4560_v55, 0.0  ;;  %v4564_v32 = vadd.f32 %v7512_v58, %v7021_v10  ;;  %v5203_v28 = vrot.slane %v5202_v27, 1  ;;  %v7894_v59 = vld [vmem:[#allocation6_spill] sm:$0xff] }
 0x2ad   :  { %v5473_v18 = vcombine.low %v7669_v48, %v7677_v29  ;;  %v4916_v6 = vmul.f32 %v7032_v13, %v4760_v11  ;;  %v4792_v22 = vmax.f32 %v4487_v8, 0.0  ;;  %v5195_v63 = vadd.f32 %v5194_v15, %v5193_v41 }
 0x2ae   :  { %v4851_v38 = vmul.f32 %v7026_v1, %v4695_v0  ;;  %v4728_v54 = vmax.f32 %v4564_v32, 0.0  ;;  %v4489_v20 = vadd.f32 %v7517_v31, %v7023_v2  ;;  %v5204_v37 = vadd.f32 %v5203_v28, %v5202_v27 }
 0x2af   :  { %v5215_v19 = vadd.f32 %v5214_v36, %v4916_v6  ;;  %v4852_v57 = vmul.f32 %v7026_v1, %v4696_v26  ;;  %v4948_v58 = vmul.f32 %v7044_v39, %v4792_v22  ;;  %v5286_v7 = vadd.f32 %v7050_v34, %v5195_v63  ;;  %v7897_v22 = vld [vmem:[#allocation27_spill] sm:$0xff] }
 0x2b0   :  { %v4884_v33 = vmul.f32 %v7029_v45, %v4728_v54  ;;  %v4793_v35 = vmax.f32 %v4489_v20, 0.0  ;;  %v4566_v5 = vadd.f32 %v7519_v12, %v7021_v10  ;;  %v5287_v60 = vadd.f32 %v7050_v34, %v5204_v37 }
 0x2b1   :  { %v5207_v56 = vadd.f32 %v5206_v21, %v4948_v58  ;;  %v4570_v31 = vadd.f32 %v7536_v42, %v7019_v3  ;;  %v4652_v53 = vadd.f32 %v7894_v59, %v7021_v10  ;;  %v4572_v40 = vadd.f32 %v7895_v25, %v7019_v3  ;;  %v7896_v42 = vld [vmem:[#allocation25_spill] sm:$0xff]  ;;  %v7903_v59 = vld [vmem:[#allocation8_spill] sm:$0xff]  ;;  %v7905_v25 = vld [vmem:[#allocation18_spill] sm:$0xff] }
 0x2b2   :  { %v5223_v62 = vadd.f32 %v4884_v33, %v4851_v38  ;;  %v4949_v4 = vmul.f32 %v7044_v39, %v4793_v35  ;;  %v4729_v24 = vmax.f32 %v4566_v5, 0.0  ;;  %v5474_v36 = vcombine.low %v5286_v7, %v5287_v60  ;;  %v7898_v38 = vld [vmem:[#allocation28_spill] sm:$0xff]  ;;  %v7900_v33 = vld [vmem:[#allocation10_spill] sm:$0xff] }
 0x2b3   :  { %v5208_v17 = vrot.slane %v5207_v56, 4  ;;  %v4761_v41 = vmax.f32 %v4570_v31, 0.0  ;;  %v4730_v12 = vmax.f32 %v4652_v53, 0.0  ;;  %v4762_v55 = vmax.f32 %v4572_v40, 0.0  ;;  %v7902_v31 = vld [vmem:[#allocation9_spill] sm:$0xff] }
 0x2b4   :  { %v5216_v51 = vadd.f32 %v5215_v19, %v4949_v4  ;;  %v4885_v0 = vmul.f32 %v7029_v45, %v4729_v24  ;;  %v4647_v27 = vadd.f32 %v7896_v42, %v7017_v9  ;;  %v7710_v10 = vrot.slane %v5426_v61, %v7047_v49  ;;  %v7904_v24 = vld [vmem:[#allocation16_spill] sm:$0xff] }
 0x2b5   :  { %v5209_v11 = vadd.f32 %v5208_v17, %v5207_v56  ;;  %v4917_v44 = vmul.f32 %v7032_v13, %v4761_v41  ;;  %v4886_v8 = vmul.f32 %v7029_v45, %v4730_v12  ;;  %v4918_v26 = vmul.f32 %v7032_v13, %v4762_v55 }
 0x2b6   :  { %v5217_v15 = vrot.slane %v5216_v51, 4  ;;  %v5232_v21 = vadd.f32 %v4885_v0, %v4852_v57  ;;  %v4697_v32 = vmax.f32 %v4647_v27, 0.0  ;;  %v4576_v9 = vadd.f32 %v7560_v47, %v7023_v2  ;;  %v7899_v47 = vld [vmem:[#allocation29_spill] sm:$0xff] }
 0x2b7   :  { %v5210_v28 = vrot.slane %v5209_v11, 2  ;;  %v5224_v6 = vadd.f32 %v5223_v62, %v4917_v44  ;;  %v4662_v46 = vadd.f32 %v7897_v22, %v7023_v2  ;;  %v4578_v45 = vadd.f32 %v7898_v38, %v7023_v2  ;;  %v7910_v22 = vld [vmem:[#allocation26_spill] sm:$0xff] }
 0x2b8   :  { %v5218_v23 = vadd.f32 %v5217_v15, %v5216_v51  ;;  %v5233_v61 = vadd.f32 %v5232_v21, %v4918_v26  ;;  %v4853_v63 = vmul.f32 %v7026_v1, %v4697_v32  ;;  %v7726_v54 = vrot.slane %v5427_v43, %v7047_v49  ;;  %v7906_v51 = vld [vmem:[#allocation13_spill] sm:$0xff] }
 0x2b9   :  { %v5211_v20 = vadd.f32 %v5210_v28, %v5209_v11  ;;  %v4794_v37 = vmax.f32 %v4576_v9, 0.0  ;;  %v4657_v19 = vadd.f32 %v7899_v47, %v7019_v3  ;;  %v4795_v7 = vmax.f32 %v4578_v45, 0.0  ;;  %v7908_v28 = vld [vmem:[#allocation24_spill] sm:$0xff] }
 0x2ba   :  { %v5219_v57 = vrot.slane %v5218_v23, 2  ;;  %v5241_v58 = vadd.f32 %v4886_v8, %v4853_v63  ;;  %v7901_v1 = vrot.slane %v7900_v33, 4  ;;  %v4796_v60 = vmax.f32 %v4662_v46, 0.0 }
 0x2bb   :  { %v5212_v5 = vrot.slane %v5211_v20, 1  ;;  %v4950_v2 = vmul.f32 %v7044_v39, %v4794_v37  ;;  %v4763_v56 = vmax.f32 %v4657_v19, 0.0  ;;  %v4951_v16 = vmul.f32 %v7044_v39, %v4795_v7 }
 0x2bc   :  { %v4957_v35 = vadd.f32 %v7901_v1, %v7900_v33  ;;  %v5220_v50 = vadd.f32 %v5219_v57, %v5218_v23  ;;  %v4962_v53 = vadd.f32 %v7903_v59, %v7902_v31  ;;  %v5359_v40 = vcombine.low %v7905_v25, %v7904_v24 }
 0x2bd   :  { %v5213_v3 = vadd.f32 %v5212_v5, %v5211_v20  ;;  %v5225_v62 = vadd.f32 %v5224_v6, %v4950_v2  ;;  %v4919_v4 = vmul.f32 %v7032_v13, %v4763_v56  ;;  %v5234_v41 = vadd.f32 %v5233_v61, %v4951_v16  ;;  %v7907_v13 = vld [vmem:[#allocation11_spill] sm:$0xff]  ;;  %v7909_v6 = vld [vmem:[#allocation20_spill] sm:$0xff] }
 0x2be   :  { %v4958_v43 = vrot.slane %v4957_v35, 2  ;;  %v5221_v17 = vrot.slane %v5220_v50, 1  ;;  %v4963_v0 = vadd.f32 %v4962_v53, %v7906_v51  ;;  %v7742_v55 = vrot.slane %v5474_v36, %v7047_v49  ;;  %v7911_v51 = vld [vmem:[#allocation14_spill] sm:$0xff] }
 0x2bf   :  { %v5226_v42 = vrot.slane %v5225_v62, 4  ;;  %v4952_v27 = vmul.f32 %v7044_v39, %v4796_v60  ;;  %v5242_v11 = vadd.f32 %v5241_v58, %v4919_v4  ;;  %v5288_v44 = vadd.f32 %v7050_v34, %v5213_v3 }
 0x2c0   :  { %v4959_v12 = vadd.f32 %v4958_v43, %v4957_v35  ;;  %v5222_v8 = vadd.f32 %v5221_v17, %v5220_v50  ;;  %v5235_v15 = vrot.slane %v5234_v41, 4  ;;  %v4964_v21 = vadd.f32 %v4963_v0, %v7907_v13  ;;  %v7912_v0 = vld [vmem:[#allocation12_spill] sm:$0xff] }
 0x2c1   :  { %v5227_v26 = vadd.f32 %v5226_v42, %v5225_v62  ;;  %v5243_v32 = vadd.f32 %v5242_v11, %v4952_v27  ;;  %v5407_v9 = vcombine.low %v7909_v6, %v7908_v28  ;;  %v5408_v46 = vcombine.low %v7910_v22, %v7590_v14 }
 0x2c2   :  { %v5289_v36 = vadd.f32 %v7050_v34, %v5222_v8  ;;  %v5236_v23 = vadd.f32 %v5235_v15, %v5234_v41  ;;  %v4960_v61 = vrot.slane %v4959_v12, 1  ;;  %v4965_v39 = vrot.slane %v4964_v21, 4 }
 0x2c3   :  { %v5228_v63 = vrot.slane %v5227_v26, 2  ;;  %v5244_v38 = vrot.slane %v5243_v32, 4  ;;  %v5415_v45 = vrot.slane %v5407_v9, %v7047_v49  ;;  %v5422_v20 = vrot.slane %v5408_v46, %v7047_v49 }
 0x2c4   :  { %v5483_v37 = vrot.slane %v5473_v18, %v7047_v49  ;;  %v5475_v47 = vcombine.low %v5288_v44, %v5289_v36  ;;  %v5237_v19 = vrot.slane %v5236_v23, 2  ;;  %v4966_v57 = vadd.f32 %v4965_v39, %v4964_v21 }
 0x2c5   :  { %v5229_v14 = vadd.f32 %v5228_v63, %v5227_v26  ;;  %v5245_v58 = vadd.f32 %v5244_v38, %v5243_v32  ;;  %v5423_v7 = vcombine.low %v5415_v45, %v5422_v20  ;;  %v5456_v33 = vcombine.low %v7640_v30, %v7666_v52 }
 0x2c6   :  { %v5238_v1 = vadd.f32 %v5237_v19, %v5236_v23  ;;  %v4967_v35 = vrot.slane %v4966_v57, 2  ;;  %v5457_v5 = vcombine.low %v7710_v10, %v7726_v54  ;;  %v4961_v56 = vadd.f32 %v4960_v61, %v4959_v12 }
 0x2c7   :  { %v5230_v2 = vrot.slane %v5229_v14, 1  ;;  %v5246_v60 = vrot.slane %v5245_v58, 2  ;;  %v5505_v48 = vcombine.low %v5483_v37, %v7742_v55  ;;  %5542 = vst [vmem:[#allocation3 + $0x8] sm:$0xff] %v5423_v7  ;;  %v5464_v50 = vrot.slane %v5456_v33, %v7047_v49 }
 0x2c8   :  { %v5239_v29 = vrot.slane %v5238_v1, 1  ;;  %v4968_v18 = vadd.f32 %v4967_v35, %v4966_v57  ;;  %v5471_v16 = vrot.slane %v5457_v5, %v7047_v49  ;;  %v5260_v62 = vadd.f32 %v7050_v34, %v4961_v56 }
 0x2c9   :  { %v5231_v43 = vadd.f32 %v5230_v2, %v5229_v14  ;;  %v5247_v31 = vadd.f32 %v5246_v60, %v5245_v58  ;;  %v7913_v55 = vcombine.low %v7911_v51, %v7912_v0  ;;  %v5497_v27 = vrot.slane %v5475_v47, %v7047_v49 }
 0x2ca   :  { %v5240_v30 = vadd.f32 %v5239_v29, %v5238_v1  ;;  %v4969_v52 = vrot.slane %v4968_v18, 1  ;;  %v5472_v59 = vcombine.low %v5464_v50, %v5471_v16  ;;  %v7914_v21 = vlaneseq }
 0x2cb   :  { %v5290_v53 = vadd.f32 %v7050_v34, %v5231_v43  ;;  %v5248_v10 = vrot.slane %v5247_v31, 1  ;;  %v5343_v42 = vrot.slane %v7913_v55, %v7047_v49  ;;  %v5373_v32 = vrot.slane %v5359_v40, %v7047_v49 }
 0x2cc   :  { %v5291_v54 = vadd.f32 %v7050_v34, %v5240_v30  ;;  %v4970_v3 = vadd.f32 %v4969_v52, %v4968_v18  ;;  %5543 = vst [vmem:[#allocation3 + $0x10] sm:$0xff] %v5472_v59  ;;  %vm5547_vm7 = vcmp.lt.s32.totalorder %v7914_v21, 128  ;;  %v5513_v28 = vrot.slane %v5505_v48, %v7047_v49 }
 0x2cd   :  { %v5249_v4 = vadd.f32 %v5248_v10, %v5247_v31 }
 0x2ce   :  { %v5476_v17 = vcombine.low %v5290_v53, %v5291_v54  ;;  %v5261_v41 = vadd.f32 %v7050_v34, %v4970_v3 }
 0x2cf   :  { %v5292_v12 = vadd.f32 %v7050_v34, %v5249_v4 }
 0x2d0   :  { %v5504_v11 = vrot.slane %v5476_v17, %v7047_v49  ;;  %v5326_v44 = vcombine.low %v5260_v62, %v5261_v41 }
 0x2d1   :  { %v5528_v8 = vrot.slane %v5292_v12, %v7047_v49 }
 0x2d2   :  { %v5336_v15 = vrot.slane %v5326_v44, %v7047_v49  ;;  %v5506_v13 = vcombine.low %v5497_v27, %v5504_v11 }
 0x2d3   :  { %v5535_v26 = vrot.slane %v5528_v8, %v7047_v49 }
 0x2d4   :  { %v5358_v34 = vcombine.low %v5336_v15, %v5343_v42  ;;  %v5520_v6 = vrot.slane %v5506_v13, %v7047_v49 }
 0x2d5   :  { %5549 = vst.msk [vmem:[#allocation3 + $0x20] sm:$0x1] %vm5547_vm7, %v5535_v26 }
 0x2d6   :  { %v5366_v9 = vrot.slane %v5358_v34, %v7047_v49  ;;  %v5521_v22 = vcombine.low %v5513_v28, %v5520_v6 }
 0x2d8   :  { %v5374_v46 = vcombine.low %v5366_v9, %v5373_v32  ;;  %5544 = vst [vmem:[#allocation3 + $0x18] sm:$0xff] %v5521_v22 }
 0x2da   :  { %5541 = vst [vmem:[#allocation3] sm:$0xff] %v5374_v46 }
 0x2db   :  { %5932 = shalt.err (!%p5929_p4)
}
 0x2dc   :  { %s5933_s0 = scalar_lea.hbm %s7805_s6, 528 }
 0x2dd   :  { %p5934_p5 = scmp.ne.s32.totalorder %s7805_s6, %s5933_s0  ;;  %p5937_p6 = scmp.lt.u32.totalorder %s5933_s0, %s7805_s6 }
 0x2df   :  { %p5939_p7 = pnand %p5937_p6, %p5934_p5 }
 0x2e1   :  { %5942 = shalt.err (!%p5939_p7)
}
 0x2e2   :  { %5559 = dma.vmem_to_hbm [thread:$0]  %s5557_s14, 528, %s7805_s6, [#allocation4]  }
 0x2e3   :  { %5943 = dma.done.wait [#allocation4], 528  }
 0x2e4   :  { %5944 = vsyncadd [#allocation4], 4294966768 }
 0x2e5   :  { %5563 = vsyncpa [#allocation4], 1 }

</bundles_post_ra>
